<compile_context>
chip_gen: v6e
topology: v6e:2x2x1
jax: 0.10.0
libtpu: 0.0.40
codegen_flags: <defaults>
</compile_context>

<pallas_src>
import functools

import jax
import jax.numpy as jnp
from jax.experimental import pallas as pl
from jax.experimental.pallas import tpu as pltpu


# ----------------------------------------------------------------------------
# Fused full-model kernel (single invocation, no grid).
# ----------------------------------------------------------------------------
def char_lm_kernel(ids_ref, w_ref, c_ref, out_ref, *,
                   batch, seqlen, hidden, heads, vocab, layers, lay):
    f32, bf16 = jnp.float32, jnp.bfloat16
    H = hidden
    T = batch * seqlen                       # rows are b-major: t = b*seqlen + s
    SV = seqlen * vocab

    # ---- embedding (one-hot matmul) + masked positional add --------------------
    ids = ids_ref[...]                                                # (T,1) int32
    onehot = (ids == jax.lax.broadcasted_iota(jnp.int32, (T, vocab), 1)).astype(bf16)
    emb_w = w_ref[lay['embed']:lay['embed'] + vocab, :]               # (V, LW) bf16
    emb = jnp.dot(onehot, emb_w, preferred_element_type=f32)[:, :H]   # (T, H) f32
    pos = c_ref[lay['pos']:lay['pos'] + T, :H]                        # pre-tiled (T, H)
    t = emb + pos * (ids != 0).astype(f32)

    # ---- constants / weights reused across layers (hoisted once) ---------------
    attn_bias = c_ref[lay['bias']:lay['bias'] + T, :T]   # (T,T) additive 0 / -1e30
    w1blk = w_ref[lay['w1']:lay['w1'] + H, :]            # (H, LW) bf16  [W1_l0|W1_l1|0]
    w2blk = w_ref[lay['w2']:lay['w2'] + H, :]            # (H, LW) bf16  [W2_l0|W2_l1|0]

    def layer_norm(v, g, b):                             # f32 throughout (eps = torch default)
        mu = jnp.mean(v, axis=-1, keepdims=True)
        var = jnp.mean((v - mu) ** 2, axis=-1, keepdims=True)
        return (v - mu) * jax.lax.rsqrt(var + 1e-5) * g + b

    # ---- encoder blocks (static unroll) -----------------------------------------
    for l in range(layers):
        lnr = c_ref[lay['ln'] + l:lay['ln'] + l + 1, :]        # (1, LW): [g1|b1|g2|b2]
        fbr = c_ref[lay['fbias'] + l:lay['fbias'] + l + 1, :]  # (1, LW): [b1|b2|0...]
        g1, b1 = lnr[:, 0:H], lnr[:, H:2 * H]
        g2, b2 = lnr[:, 2 * H:3 * H], lnr[:, 3 * H:4 * H]
        fb1, fb2 = fbr[:, 0:H], fbr[:, H:2 * H]

        # pre-LN multi-head causal self-attention (Wq·Wkᵀ and Wv·Wo pre-folded)
        x1 = layer_norm(t, g1, b1).astype(bf16)                            # (T, H) bf16
        wqk = w_ref[lay['qk'] + l * H:lay['qk'] + (l + 1) * H, :]          # (H, heads*H)
        wvo = w_ref[lay['vo'] + l * H:lay['vo'] + (l + 1) * H, :]          # (H, heads*H)
        a_all = jnp.dot(x1, wqk, preferred_element_type=f32)   # (T, heads*H), 1/sqrt(hd) baked
        b_all = jnp.dot(x1, wvo, preferred_element_type=f32)   # (T, heads*H)

        attn = jnp.zeros((T, H), f32)
        for h in range(heads):                                  # static unroll
            a_h = a_all[:, h * H:(h + 1) * H].astype(bf16)      # (T, H)
            s = jax.lax.dot_general(a_h, x1, (((1,), (1,)), ((), ())),
                                    preferred_element_type=f32)  # (T, T) = scaled q·kᵀ
            s = s + attn_bias                                    # block-diag + causal
            m = jnp.max(s, axis=-1, keepdims=True)
            p = jnp.exp(s - m)
            p = p * pl.reciprocal(jnp.sum(p, axis=-1, keepdims=True), approx=True)
            b_h = b_all[:, h * H:(h + 1) * H].astype(bf16)       # (T, H) = (x1·Wv_h)·Wo_h
            attn = attn + jnp.dot(p.astype(bf16), b_h, preferred_element_type=f32)
        t = t + attn                                             # residual (dropout = identity)

        # pre-LN position-wise FFN
        x3 = layer_norm(t, g2, b2).astype(bf16)
        h1 = jnp.dot(x3, w1blk, preferred_element_type=f32)[:, l * H:(l + 1) * H]
        h1 = jnp.maximum(h1 + fb1, 0.0)
        h2 = jnp.dot(h1.astype(bf16), w2blk,
                     preferred_element_type=f32)[:, l * H:(l + 1) * H] + fb2
        t = t + h2                                               # residual (dropout = identity)

    # ---- final head: out[b,v] = sum_{s,h} tanh(t[b*S+s,h]) * Wf[v, s*H+h] + fb[v] ----
    # matmuls + precomputed 0/1 masks; no in-kernel (B*S,H) -> (B,S*H) relayout,
    # selection/fold kept in f32 for precision.
    th = jnp.tanh(t).astype(bf16)                                # (T, H)
    wf = w_ref[lay['wf']:lay['wf'] + H, :]                       # (H, LW), lanes [:SV] valid
    contrib = jnp.dot(th, wf, preferred_element_type=f32)        # (T, LW)
    keep = c_ref[lay['keep']:lay['keep'] + T, :]                 # (T, LW) row picks own s-block
    masked = contrib * keep                                      # f32
    sel = c_ref[lay['sel']:lay['sel'] + batch, :T]               # (B, T) batch selector
    g = jnp.dot(sel, masked, preferred_element_type=f32)         # (B, LW)
    fold = c_ref[lay['fold']:lay['fold'] + SV, :vocab]           # (SV, V) fold over positions
    out = jnp.dot(g[:, :SV], fold, preferred_element_type=f32)   # (B, V)
    out_ref[...] = out + c_ref[lay['fb']:lay['fb'] + 1, :vocab]


# ----------------------------------------------------------------------------
# Wrapper: single pallas_call for the whole forward.
# ----------------------------------------------------------------------------
def make_forward(lay, *, batch, maxlen, hidden, heads, vocab, layers):
    kernel = functools.partial(char_lm_kernel, batch=batch, seqlen=maxlen,
                               hidden=hidden, heads=heads, vocab=vocab,
                               layers=layers, lay=lay)
    call = pl.pallas_call(
        kernel,
        out_shape=jax.ShapeDtypeStruct((batch, vocab), jnp.float32),
        compiler_params=pltpu.CompilerParams(vmem_limit_bytes=16 * 1024 * 1024),
    )

    @jax.jit
    def fwd(x, w_slab, c_slab):
        ids = x.reshape(batch * maxlen, 1).astype(jnp.int32)
        out = call(ids, w_slab, c_slab)
        return out.reshape(batch, 1, vocab)

    return fwd


# ----------------------------------------------------------------------------
# Deterministic parameter construction (synthetic, not a checkpoint load) and
# packing into the two slabs + static layout offsets.
# ----------------------------------------------------------------------------
def build_params(key, *, vocab, maxlen, hidden, heads, num_layers, batch, lane=128):
    hd = hidden // heads
    T = batch * maxlen
    SV = maxlen * vocab
    assert hidden % heads == 0
    for w in (heads * hidden, num_layers * hidden, SV, T, 4 * hidden, vocab, hidden):
        assert w <= lane, "packed lane width exceeds slab width"

    keys = iter(jax.random.split(key, 3 + 6 * num_layers))
    init_scale = 0.05

    def nrm(shape):
        return jax.random.normal(next(keys), shape, jnp.float32) * init_scale

    embed = nrm((vocab, hidden)).at[0].set(0.0)        # embed.weight.data[0].fill_(0)
    pos = nrm((maxlen, hidden))

    wqk_l, wvo_l, w1_l, w2_l = [], [], [], []
    inv_sqrt_hd = 1.0 / float(hd) ** 0.5
    for _ in range(num_layers):
        Wq, Wk, Wv, Wo, W1, W2 = (nrm((hidden, hidden)) for _ in range(6))   # torch (out,in)
        wq_t, wk_t, wv_t, wo_t = Wq.T, Wk.T, Wv.T, Wo.T                      # (in, out)
        qk_h, vo_h = [], []
        for h in range(heads):
            sl = slice(h * hd, (h + 1) * hd)
            qk_h.append((wq_t[:, sl] @ wk_t[:, sl].T) * inv_sqrt_hd)         # (H,H) folded+scaled
            vo_h.append(wv_t[:, sl] @ wo_t[sl, :])                           # (H,H) folded
        wqk_l.append(jnp.concatenate(qk_h, axis=1))                          # (H, heads*H)
        wvo_l.append(jnp.concatenate(vo_h, axis=1))
        w1_l.append(W1.T)
        w2_l.append(W2.T)

    final_w = nrm((vocab, hidden * maxlen))
    # Wf_wide[h, s*V + v] = final_w[v, s*H + h]   (lane-dense (H, S*V) layout)
    wf_wide = final_w.reshape(vocab, maxlen, hidden).transpose(2, 1, 0).reshape(hidden, SV)

    # ---- packing helpers --------------------------------------------------------
    lay = {}

    def pack(parts, rowpad, dtype):
        blocks, off = [], 0
        for name, a in parts:
            a = jnp.asarray(a, jnp.float32)
            r, c = a.shape
            rp = -r % rowpad
            blocks.append(jnp.pad(a, ((0, rp), (0, lane - c))))
            lay[name] = off
            off += r + rp
        return jnp.concatenate(blocks, axis=0).astype(dtype)

    w_slab = pack([('embed', embed),
                   ('qk', jnp.concatenate(wqk_l, axis=0)),   # (L*H, heads*H)
                   ('vo', jnp.concatenate(wvo_l, axis=0)),   # (L*H, heads*H)
                   ('w1', jnp.concatenate(w1_l, axis=1)),    # (H, L*H)
                   ('w2', jnp.concatenate(w2_l, axis=1)),    # (H, L*H)
                   ('wf', wf_wide)], 16, jnp.bfloat16)

    # static masks / constants (precomputed once; no in-kernel iota work)
    ri = jnp.arange(T)[:, None]
    ci = jnp.arange(T)[None, :]
    allow = ((ri // maxlen) == (ci // maxlen)) & ((ri % maxlen) >= (ci % maxlen))
    attn_bias = jnp.where(allow, 0.0, -1e30).astype(jnp.float32)             # (T, T)
    keep = ((jnp.arange(T)[:, None] % maxlen) ==
            (jnp.arange(SV)[None, :] // vocab)).astype(jnp.float32)          # (T, SV)
    sel = ((jnp.arange(T)[None, :] // maxlen) ==
           jnp.arange(batch)[:, None]).astype(jnp.float32)                   # (B, T)
    fold = ((jnp.arange(SV)[:, None] % vocab) ==
            jnp.arange(vocab)[None, :]).astype(jnp.float32)                  # (SV, V)
    ones_h = jnp.ones((num_layers, hidden), jnp.float32)
    zeros_h = jnp.zeros((num_layers, hidden), jnp.float32)
    ln_rows = jnp.concatenate([ones_h, zeros_h, ones_h, zeros_h], axis=1)    # [g1|b1|g2|b2]
    fbias_rows = jnp.zeros((num_layers, 2 * hidden), jnp.float32)            # [b1|b2]
    fb = jnp.zeros((1, vocab), jnp.float32)
    pos_tiled = jnp.tile(pos, (batch, 1))                                    # (T, H)

    c_slab = pack([('pos', pos_tiled), ('bias', attn_bias), ('keep', keep),
                   ('fold', fold), ('sel', sel), ('ln', ln_rows),
                   ('fbias', fbias_rows), ('fb', fb)], 8, jnp.float32)

    return w_slab, c_slab, lay


if __name__ == "__main__":
    # config: hidden_size=32, number_of_attention_heads=4, dropout_prob=0.1,
    #         number_of_transformer_encoders=2; no_of_input_chars=16; MAXLEN=8
    B, MAXLEN, H, HEADS, LAYERS, VOCAB = 2, 8, 32, 4, 2, 16

    key = jax.random.PRNGKey(0)
    pkey, xkey = jax.random.split(key)
    w_slab, c_slab, lay = build_params(pkey, vocab=VOCAB, maxlen=MAXLEN, hidden=H,
                                       heads=HEADS, num_layers=LAYERS, batch=B)

    # token ids in [0, VOCAB); include some 0s (padding) to exercise the mask.
    x = jax.random.randint(xkey, (B, MAXLEN), 0, VOCAB, dtype=jnp.int32)
    x = x.at[0, -2:].set(0)

    fwd = make_forward(lay, batch=B, maxlen=MAXLEN, hidden=H, heads=HEADS,
                       vocab=VOCAB, layers=LAYERS)
    out = jax.block_until_ready(fwd(x, w_slab, c_slab))
    assert out.shape == (B, 1, VOCAB) and out.dtype == jnp.float32
    assert bool(jnp.all(jnp.isfinite(out)))
    print("KERNEL_OK")
</pallas_src>

<mosaic_0001>
module attributes {stable_mosaic.version = 11 : i64} {
  func.func @char_lm_kernel(%arg0: memref<16x1xi32, #tpu.memory_space<vmem>>, %arg1: memref<240x128xbf16, #tpu.memory_space<vmem>>, %arg2: memref<208x128xf32, #tpu.memory_space<vmem>>, %arg3: memref<2x16xf32, #tpu.memory_space<vmem>>) attributes {dimension_semantics = [], scalar_prefetch = 0 : i64, scratch_operands = 0 : i64, tpu.core_type = #tpu.core_type<tc>} {
    %c0 = arith.constant 0 : index
    %c0_0 = arith.constant 0 : index
    %0 = vector.load %arg0[%c0, %c0_0] : memref<16x1xi32, #tpu.memory_space<vmem>>, vector<16x1xi32>
    %1 = tpu.iota {dimensions = array<i32: 1>} : vector<16x16xi32>
    %2 = vector.broadcast %0 : vector<16x1xi32> to vector<16x16xi32>
    %3 = arith.cmpi eq, %2, %1 : vector<16x16xi32>
    %4 = arith.extui %3 : vector<16x16xi1> to vector<16x16xi32>
    %5 = arith.sitofp %4 : vector<16x16xi32> to vector<16x16xf32>
    %6 = arith.truncf %5 : vector<16x16xf32> to vector<16x16xbf16>
    %c0_1 = arith.constant 0 : index
    %c0_2 = arith.constant 0 : index
    %7 = vector.load %arg1[%c0_1, %c0_2] : memref<240x128xbf16, #tpu.memory_space<vmem>>, vector<16x128xbf16>
    %cst = arith.constant dense<0.000000e+00> : vector<16x128xf32>
    %8 = tpu.matmul %6, %7, %cst {dimension_numbers = #tpu.dot_dimension_numbers<[1], [0], [0], [1], [0, 0, 1, 1], [], []>} : vector<16x16xbf16>, vector<16x128xbf16>, vector<16x128xf32> -> vector<16x128xf32>
    %9 = vector.extract_strided_slice %8 {offsets = [0, 0], sizes = [16, 32], strides = [1, 1]} : vector<16x128xf32> to vector<16x32xf32>
    %c0_3 = arith.constant 0 : index
    %c0_4 = arith.constant 0 : index
    %10 = vector.load %arg2[%c0_3, %c0_4] : memref<208x128xf32, #tpu.memory_space<vmem>>, vector<16x32xf32>
    %c0_i32 = arith.constant 0 : i32
    %11 = vector.broadcast %c0_i32 : i32 to vector<16x1xi32>
    %12 = arith.cmpi ne, %0, %11 : vector<16x1xi32>
    %13 = arith.extui %12 : vector<16x1xi1> to vector<16x1xi32>
    %14 = arith.sitofp %13 : vector<16x1xi32> to vector<16x1xf32>
    %15 = vector.broadcast %14 : vector<16x1xf32> to vector<16x32xf32>
    %16 = arith.mulf %10, %15 : vector<16x32xf32>
    %17 = arith.addf %9, %16 : vector<16x32xf32>
    %c16 = arith.constant 16 : index
    %c0_5 = arith.constant 0 : index
    %18 = vector.load %arg2[%c16, %c0_5] : memref<208x128xf32, #tpu.memory_space<vmem>>, vector<16x16xf32>
    %c144 = arith.constant 144 : index
    %c0_6 = arith.constant 0 : index
    %19 = vector.load %arg1[%c144, %c0_6] : memref<240x128xbf16, #tpu.memory_space<vmem>>, vector<32x128xbf16>
    %c176 = arith.constant 176 : index
    %c0_7 = arith.constant 0 : index
    %20 = vector.load %arg1[%c176, %c0_7] : memref<240x128xbf16, #tpu.memory_space<vmem>>, vector<32x128xbf16>
    %c184 = arith.constant 184 : index
    %c0_8 = arith.constant 0 : index
    %21 = vector.load %arg2[%c184, %c0_8] : memref<208x128xf32, #tpu.memory_space<vmem>>, vector<1x128xf32>
    %c192 = arith.constant 192 : index
    %c0_9 = arith.constant 0 : index
    %22 = vector.load %arg2[%c192, %c0_9] : memref<208x128xf32, #tpu.memory_space<vmem>>, vector<1x128xf32>
    %23 = vector.extract_strided_slice %21 {offsets = [0, 0], sizes = [1, 32], strides = [1, 1]} : vector<1x128xf32> to vector<1x32xf32>
    %24 = vector.extract_strided_slice %21 {offsets = [0, 32], sizes = [1, 32], strides = [1, 1]} : vector<1x128xf32> to vector<1x32xf32>
    %25 = vector.extract_strided_slice %21 {offsets = [0, 64], sizes = [1, 32], strides = [1, 1]} : vector<1x128xf32> to vector<1x32xf32>
    %26 = vector.extract_strided_slice %21 {offsets = [0, 96], sizes = [1, 32], strides = [1, 1]} : vector<1x128xf32> to vector<1x32xf32>
    %27 = vector.extract_strided_slice %22 {offsets = [0, 0], sizes = [1, 32], strides = [1, 1]} : vector<1x128xf32> to vector<1x32xf32>
    %28 = vector.extract_strided_slice %22 {offsets = [0, 32], sizes = [1, 32], strides = [1, 1]} : vector<1x128xf32> to vector<1x32xf32>
    %cst_10 = arith.constant dense<0.000000e+00> : vector<16xf32>
    %29 = vector.multi_reduction <add>, %17, %cst_10 [1] : vector<16x32xf32> to vector<16xf32>
    %30 = vector.shape_cast %29 : vector<16xf32> to vector<16x1xf32>
    %cst_11 = arith.constant 3.200000e+01 : f32
    %31 = vector.broadcast %cst_11 : f32 to vector<16x1xf32>
    %32 = arith.divf %30, %31 : vector<16x1xf32>
    %33 = vector.broadcast %32 : vector<16x1xf32> to vector<16x32xf32>
    %34 = arith.subf %17, %33 : vector<16x32xf32>
    %35 = arith.mulf %34, %34 : vector<16x32xf32>
    %cst_12 = arith.constant dense<0.000000e+00> : vector<16xf32>
    %36 = vector.multi_reduction <add>, %35, %cst_12 [1] : vector<16x32xf32> to vector<16xf32>
    %37 = vector.shape_cast %36 : vector<16xf32> to vector<16x1xf32>
    %cst_13 = arith.constant 3.200000e+01 : f32
    %38 = vector.broadcast %cst_13 : f32 to vector<16x1xf32>
    %39 = arith.divf %37, %38 : vector<16x1xf32>
    %40 = vector.broadcast %32 : vector<16x1xf32> to vector<16x32xf32>
    %41 = arith.subf %17, %40 : vector<16x32xf32>
    %cst_14 = arith.constant 9.99999974E-6 : f32
    %42 = vector.broadcast %cst_14 : f32 to vector<16x1xf32>
    %43 = arith.addf %39, %42 : vector<16x1xf32>
    %44 = math.rsqrt %43 : vector<16x1xf32>
    %45 = vector.broadcast %44 : vector<16x1xf32> to vector<16x32xf32>
    %46 = arith.mulf %41, %45 : vector<16x32xf32>
    %47 = vector.broadcast %23 : vector<1x32xf32> to vector<16x32xf32>
    %48 = arith.mulf %46, %47 : vector<16x32xf32>
    %49 = vector.broadcast %24 : vector<1x32xf32> to vector<16x32xf32>
    %50 = arith.addf %48, %49 : vector<16x32xf32>
    %51 = arith.truncf %50 : vector<16x32xf32> to vector<16x32xbf16>
    %c16_15 = arith.constant 16 : index
    %c0_16 = arith.constant 0 : index
    %52 = vector.load %arg1[%c16_15, %c0_16] : memref<240x128xbf16, #tpu.memory_space<vmem>>, vector<32x128xbf16>
    %c80 = arith.constant 80 : index
    %c0_17 = arith.constant 0 : index
    %53 = vector.load %arg1[%c80, %c0_17] : memref<240x128xbf16, #tpu.memory_space<vmem>>, vector<32x128xbf16>
    %cst_18 = arith.constant dense<0.000000e+00> : vector<16x128xf32>
    %54 = tpu.matmul %51, %52, %cst_18 {dimension_numbers = #tpu.dot_dimension_numbers<[1], [0], [0], [1], [0, 0, 1, 1], [], []>} : vector<16x32xbf16>, vector<32x128xbf16>, vector<16x128xf32> -> vector<16x128xf32>
    %cst_19 = arith.constant dense<0.000000e+00> : vector<16x128xf32>
    %55 = tpu.matmul %51, %53, %cst_19 {dimension_numbers = #tpu.dot_dimension_numbers<[1], [0], [0], [1], [0, 0, 1, 1], [], []>} : vector<16x32xbf16>, vector<32x128xbf16>, vector<16x128xf32> -> vector<16x128xf32>
    %cst_20 = arith.constant 0.000000e+00 : f32
    %56 = vector.broadcast %cst_20 : f32 to vector<16x32xf32>
    %57 = vector.extract_strided_slice %54 {offsets = [0, 0], sizes = [16, 32], strides = [1, 1]} : vector<16x128xf32> to vector<16x32xf32>
    %58 = arith.truncf %57 : vector<16x32xf32> to vector<16x32xbf16>
    %cst_21 = arith.constant dense<0.000000e+00> : vector<16x16xf32>
    %59 = tpu.matmul %58, %51, %cst_21 {dimension_numbers = #tpu.dot_dimension_numbers<[1], [1], [0], [0], [0, 0, 1, 0], [], []>} : vector<16x32xbf16>, vector<16x32xbf16>, vector<16x16xf32> -> vector<16x16xf32>
    %60 = arith.addf %59, %18 : vector<16x16xf32>
    %cst_22 = arith.constant dense<0xFF800000> : vector<16xf32>
    %61 = vector.multi_reduction <maximumf>, %60, %cst_22 [1] : vector<16x16xf32> to vector<16xf32>
    %62 = vector.shape_cast %61 : vector<16xf32> to vector<16x1xf32>
    %63 = vector.broadcast %62 : vector<16x1xf32> to vector<16x16xf32>
    %64 = arith.subf %60, %63 : vector<16x16xf32>
    %65 = math.exp %64 : vector<16x16xf32>
    %cst_23 = arith.constant dense<0.000000e+00> : vector<16xf32>
    %66 = vector.multi_reduction <add>, %65, %cst_23 [1] : vector<16x16xf32> to vector<16xf32>
    %67 = vector.shape_cast %66 : vector<16xf32> to vector<16x1xf32>
    %68 = tpu.reciprocal %67 {approx = true} : vector<16x1xf32> -> vector<16x1xf32>
    %69 = vector.broadcast %68 : vector<16x1xf32> to vector<16x16xf32>
    %70 = arith.mulf %65, %69 : vector<16x16xf32>
    %71 = vector.extract_strided_slice %55 {offsets = [0, 0], sizes = [16, 32], strides = [1, 1]} : vector<16x128xf32> to vector<16x32xf32>
    %72 = arith.truncf %71 : vector<16x32xf32> to vector<16x32xbf16>
    %73 = arith.truncf %70 : vector<16x16xf32> to vector<16x16xbf16>
    %cst_24 = arith.constant dense<0.000000e+00> : vector<16x32xf32>
    %74 = tpu.matmul %73, %72, %cst_24 {dimension_numbers = #tpu.dot_dimension_numbers<[1], [0], [0], [1], [0, 0, 1, 1], [], []>} : vector<16x16xbf16>, vector<16x32xbf16>, vector<16x32xf32> -> vector<16x32xf32>
    %75 = arith.addf %56, %74 : vector<16x32xf32>
    %76 = vector.extract_strided_slice %54 {offsets = [0, 32], sizes = [16, 32], strides = [1, 1]} : vector<16x128xf32> to vector<16x32xf32>
    %77 = arith.truncf %76 : vector<16x32xf32> to vector<16x32xbf16>
    %cst_25 = arith.constant dense<0.000000e+00> : vector<16x16xf32>
    %78 = tpu.matmul %77, %51, %cst_25 {dimension_numbers = #tpu.dot_dimension_numbers<[1], [1], [0], [0], [0, 0, 1, 0], [], []>} : vector<16x32xbf16>, vector<16x32xbf16>, vector<16x16xf32> -> vector<16x16xf32>
    %79 = arith.addf %78, %18 : vector<16x16xf32>
    %cst_26 = arith.constant dense<0xFF800000> : vector<16xf32>
    %80 = vector.multi_reduction <maximumf>, %79, %cst_26 [1] : vector<16x16xf32> to vector<16xf32>
    %81 = vector.shape_cast %80 : vector<16xf32> to vector<16x1xf32>
    %82 = vector.broadcast %81 : vector<16x1xf32> to vector<16x16xf32>
    %83 = arith.subf %79, %82 : vector<16x16xf32>
    %84 = math.exp %83 : vector<16x16xf32>
    %cst_27 = arith.constant dense<0.000000e+00> : vector<16xf32>
    %85 = vector.multi_reduction <add>, %84, %cst_27 [1] : vector<16x16xf32> to vector<16xf32>
    %86 = vector.shape_cast %85 : vector<16xf32> to vector<16x1xf32>
    %87 = tpu.reciprocal %86 {approx = true} : vector<16x1xf32> -> vector<16x1xf32>
    %88 = vector.broadcast %87 : vector<16x1xf32> to vector<16x16xf32>
    %89 = arith.mulf %84, %88 : vector<16x16xf32>
    %90 = vector.extract_strided_slice %55 {offsets = [0, 32], sizes = [16, 32], strides = [1, 1]} : vector<16x128xf32> to vector<16x32xf32>
    %91 = arith.truncf %90 : vector<16x32xf32> to vector<16x32xbf16>
    %92 = arith.truncf %89 : vector<16x16xf32> to vector<16x16xbf16>
    %cst_28 = arith.constant dense<0.000000e+00> : vector<16x32xf32>
    %93 = tpu.matmul %92, %91, %cst_28 {dimension_numbers = #tpu.dot_dimension_numbers<[1], [0], [0], [1], [0, 0, 1, 1], [], []>} : vector<16x16xbf16>, vector<16x32xbf16>, vector<16x32xf32> -> vector<16x32xf32>
    %94 = arith.addf %75, %93 : vector<16x32xf32>
    %95 = vector.extract_strided_slice %54 {offsets = [0, 64], sizes = [16, 32], strides = [1, 1]} : vector<16x128xf32> to vector<16x32xf32>
    %96 = arith.truncf %95 : vector<16x32xf32> to vector<16x32xbf16>
    %cst_29 = arith.constant dense<0.000000e+00> : vector<16x16xf32>
    %97 = tpu.matmul %96, %51, %cst_29 {dimension_numbers = #tpu.dot_dimension_numbers<[1], [1], [0], [0], [0, 0, 1, 0], [], []>} : vector<16x32xbf16>, vector<16x32xbf16>, vector<16x16xf32> -> vector<16x16xf32>
    %98 = arith.addf %97, %18 : vector<16x16xf32>
    %cst_30 = arith.constant dense<0xFF800000> : vector<16xf32>
    %99 = vector.multi_reduction <maximumf>, %98, %cst_30 [1] : vector<16x16xf32> to vector<16xf32>
    %100 = vector.shape_cast %99 : vector<16xf32> to vector<16x1xf32>
    %101 = vector.broadcast %100 : vector<16x1xf32> to vector<16x16xf32>
    %102 = arith.subf %98, %101 : vector<16x16xf32>
    %103 = math.exp %102 : vector<16x16xf32>
    %cst_31 = arith.constant dense<0.000000e+00> : vector<16xf32>
    %104 = vector.multi_reduction <add>, %103, %cst_31 [1] : vector<16x16xf32> to vector<16xf32>
    %105 = vector.shape_cast %104 : vector<16xf32> to vector<16x1xf32>
    %106 = tpu.reciprocal %105 {approx = true} : vector<16x1xf32> -> vector<16x1xf32>
    %107 = vector.broadcast %106 : vector<16x1xf32> to vector<16x16xf32>
    %108 = arith.mulf %103, %107 : vector<16x16xf32>
    %109 = vector.extract_strided_slice %55 {offsets = [0, 64], sizes = [16, 32], strides = [1, 1]} : vector<16x128xf32> to vector<16x32xf32>
    %110 = arith.truncf %109 : vector<16x32xf32> to vector<16x32xbf16>
    %111 = arith.truncf %108 : vector<16x16xf32> to vector<16x16xbf16>
    %cst_32 = arith.constant dense<0.000000e+00> : vector<16x32xf32>
    %112 = tpu.matmul %111, %110, %cst_32 {dimension_numbers = #tpu.dot_dimension_numbers<[1], [0], [0], [1], [0, 0, 1, 1], [], []>} : vector<16x16xbf16>, vector<16x32xbf16>, vector<16x32xf32> -> vector<16x32xf32>
    %113 = arith.addf %94, %112 : vector<16x32xf32>
    %114 = vector.extract_strided_slice %54 {offsets = [0, 96], sizes = [16, 32], strides = [1, 1]} : vector<16x128xf32> to vector<16x32xf32>
    %115 = arith.truncf %114 : vector<16x32xf32> to vector<16x32xbf16>
    %cst_33 = arith.constant dense<0.000000e+00> : vector<16x16xf32>
    %116 = tpu.matmul %115, %51, %cst_33 {dimension_numbers = #tpu.dot_dimension_numbers<[1], [1], [0], [0], [0, 0, 1, 0], [], []>} : vector<16x32xbf16>, vector<16x32xbf16>, vector<16x16xf32> -> vector<16x16xf32>
    %117 = arith.addf %116, %18 : vector<16x16xf32>
    %cst_34 = arith.constant dense<0xFF800000> : vector<16xf32>
    %118 = vector.multi_reduction <maximumf>, %117, %cst_34 [1] : vector<16x16xf32> to vector<16xf32>
    %119 = vector.shape_cast %118 : vector<16xf32> to vector<16x1xf32>
    %120 = vector.broadcast %119 : vector<16x1xf32> to vector<16x16xf32>
    %121 = arith.subf %117, %120 : vector<16x16xf32>
    %122 = math.exp %121 : vector<16x16xf32>
    %cst_35 = arith.constant dense<0.000000e+00> : vector<16xf32>
    %123 = vector.multi_reduction <add>, %122, %cst_35 [1] : vector<16x16xf32> to vector<16xf32>
    %124 = vector.shape_cast %123 : vector<16xf32> to vector<16x1xf32>
    %125 = tpu.reciprocal %124 {approx = true} : vector<16x1xf32> -> vector<16x1xf32>
    %126 = vector.broadcast %125 : vector<16x1xf32> to vector<16x16xf32>
    %127 = arith.mulf %122, %126 : vector<16x16xf32>
    %128 = vector.extract_strided_slice %55 {offsets = [0, 96], sizes = [16, 32], strides = [1, 1]} : vector<16x128xf32> to vector<16x32xf32>
    %129 = arith.truncf %128 : vector<16x32xf32> to vector<16x32xbf16>
    %130 = arith.truncf %127 : vector<16x16xf32> to vector<16x16xbf16>
    %cst_36 = arith.constant dense<0.000000e+00> : vector<16x32xf32>
    %131 = tpu.matmul %130, %129, %cst_36 {dimension_numbers = #tpu.dot_dimension_numbers<[1], [0], [0], [1], [0, 0, 1, 1], [], []>} : vector<16x16xbf16>, vector<16x32xbf16>, vector<16x32xf32> -> vector<16x32xf32>
    %132 = arith.addf %113, %131 : vector<16x32xf32>
    %133 = arith.addf %17, %132 : vector<16x32xf32>
    %cst_37 = arith.constant dense<0.000000e+00> : vector<16xf32>
    %134 = vector.multi_reduction <add>, %133, %cst_37 [1] : vector<16x32xf32> to vector<16xf32>
    %135 = vector.shape_cast %134 : vector<16xf32> to vector<16x1xf32>
    %cst_38 = arith.constant 3.200000e+01 : f32
    %136 = vector.broadcast %cst_38 : f32 to vector<16x1xf32>
    %137 = arith.divf %135, %136 : vector<16x1xf32>
    %138 = vector.broadcast %137 : vector<16x1xf32> to vector<16x32xf32>
    %139 = arith.subf %133, %138 : vector<16x32xf32>
    %140 = arith.mulf %139, %139 : vector<16x32xf32>
    %cst_39 = arith.constant dense<0.000000e+00> : vector<16xf32>
    %141 = vector.multi_reduction <add>, %140, %cst_39 [1] : vector<16x32xf32> to vector<16xf32>
    %142 = vector.shape_cast %141 : vector<16xf32> to vector<16x1xf32>
    %cst_40 = arith.constant 3.200000e+01 : f32
    %143 = vector.broadcast %cst_40 : f32 to vector<16x1xf32>
    %144 = arith.divf %142, %143 : vector<16x1xf32>
    %145 = vector.broadcast %137 : vector<16x1xf32> to vector<16x32xf32>
    %146 = arith.subf %133, %145 : vector<16x32xf32>
    %cst_41 = arith.constant 9.99999974E-6 : f32
    %147 = vector.broadcast %cst_41 : f32 to vector<16x1xf32>
    %148 = arith.addf %144, %147 : vector<16x1xf32>
    %149 = math.rsqrt %148 : vector<16x1xf32>
    %150 = vector.broadcast %149 : vector<16x1xf32> to vector<16x32xf32>
    %151 = arith.mulf %146, %150 : vector<16x32xf32>
    %152 = vector.broadcast %25 : vector<1x32xf32> to vector<16x32xf32>
    %153 = arith.mulf %151, %152 : vector<16x32xf32>
    %154 = vector.broadcast %26 : vector<1x32xf32> to vector<16x32xf32>
    %155 = arith.addf %153, %154 : vector<16x32xf32>
    %156 = arith.truncf %155 : vector<16x32xf32> to vector<16x32xbf16>
    %cst_42 = arith.constant dense<0.000000e+00> : vector<16x128xf32>
    %157 = tpu.matmul %156, %19, %cst_42 {dimension_numbers = #tpu.dot_dimension_numbers<[1], [0], [0], [1], [0, 0, 1, 1], [], []>} : vector<16x32xbf16>, vector<32x128xbf16>, vector<16x128xf32> -> vector<16x128xf32>
    %158 = vector.extract_strided_slice %157 {offsets = [0, 0], sizes = [16, 32], strides = [1, 1]} : vector<16x128xf32> to vector<16x32xf32>
    %159 = vector.broadcast %27 : vector<1x32xf32> to vector<16x32xf32>
    %160 = arith.addf %158, %159 : vector<16x32xf32>
    %cst_43 = arith.constant 0.000000e+00 : f32
    %161 = vector.broadcast %cst_43 : f32 to vector<16x32xf32>
    %162 = arith.maximumf %160, %161 : vector<16x32xf32>
    %163 = arith.truncf %162 : vector<16x32xf32> to vector<16x32xbf16>
    %cst_44 = arith.constant dense<0.000000e+00> : vector<16x128xf32>
    %164 = tpu.matmul %163, %20, %cst_44 {dimension_numbers = #tpu.dot_dimension_numbers<[1], [0], [0], [1], [0, 0, 1, 1], [], []>} : vector<16x32xbf16>, vector<32x128xbf16>, vector<16x128xf32> -> vector<16x128xf32>
    %165 = vector.extract_strided_slice %164 {offsets = [0, 0], sizes = [16, 32], strides = [1, 1]} : vector<16x128xf32> to vector<16x32xf32>
    %166 = vector.broadcast %28 : vector<1x32xf32> to vector<16x32xf32>
    %167 = arith.addf %165, %166 : vector<16x32xf32>
    %168 = arith.addf %133, %167 : vector<16x32xf32>
    %c185 = arith.constant 185 : index
    %c0_45 = arith.constant 0 : index
    %169 = vector.load %arg2[%c185, %c0_45] : memref<208x128xf32, #tpu.memory_space<vmem>>, vector<1x128xf32>
    %c193 = arith.constant 193 : index
    %c0_46 = arith.constant 0 : index
    %170 = vector.load %arg2[%c193, %c0_46] : memref<208x128xf32, #tpu.memory_space<vmem>>, vector<1x128xf32>
    %171 = vector.extract_strided_slice %169 {offsets = [0, 0], sizes = [1, 32], strides = [1, 1]} : vector<1x128xf32> to vector<1x32xf32>
    %172 = vector.extract_strided_slice %169 {offsets = [0, 32], sizes = [1, 32], strides = [1, 1]} : vector<1x128xf32> to vector<1x32xf32>
    %173 = vector.extract_strided_slice %169 {offsets = [0, 64], sizes = [1, 32], strides = [1, 1]} : vector<1x128xf32> to vector<1x32xf32>
    %174 = vector.extract_strided_slice %169 {offsets = [0, 96], sizes = [1, 32], strides = [1, 1]} : vector<1x128xf32> to vector<1x32xf32>
    %175 = vector.extract_strided_slice %170 {offsets = [0, 0], sizes = [1, 32], strides = [1, 1]} : vector<1x128xf32> to vector<1x32xf32>
    %176 = vector.extract_strided_slice %170 {offsets = [0, 32], sizes = [1, 32], strides = [1, 1]} : vector<1x128xf32> to vector<1x32xf32>
    %cst_47 = arith.constant dense<0.000000e+00> : vector<16xf32>
    %177 = vector.multi_reduction <add>, %168, %cst_47 [1] : vector<16x32xf32> to vector<16xf32>
    %178 = vector.shape_cast %177 : vector<16xf32> to vector<16x1xf32>
    %cst_48 = arith.constant 3.200000e+01 : f32
    %179 = vector.broadcast %cst_48 : f32 to vector<16x1xf32>
    %180 = arith.divf %178, %179 : vector<16x1xf32>
    %181 = vector.broadcast %180 : vector<16x1xf32> to vector<16x32xf32>
    %182 = arith.subf %168, %181 : vector<16x32xf32>
    %183 = arith.mulf %182, %182 : vector<16x32xf32>
    %cst_49 = arith.constant dense<0.000000e+00> : vector<16xf32>
    %184 = vector.multi_reduction <add>, %183, %cst_49 [1] : vector<16x32xf32> to vector<16xf32>
    %185 = vector.shape_cast %184 : vector<16xf32> to vector<16x1xf32>
    %cst_50 = arith.constant 3.200000e+01 : f32
    %186 = vector.broadcast %cst_50 : f32 to vector<16x1xf32>
    %187 = arith.divf %185, %186 : vector<16x1xf32>
    %188 = vector.broadcast %180 : vector<16x1xf32> to vector<16x32xf32>
    %189 = arith.subf %168, %188 : vector<16x32xf32>
    %cst_51 = arith.constant 9.99999974E-6 : f32
    %190 = vector.broadcast %cst_51 : f32 to vector<16x1xf32>
    %191 = arith.addf %187, %190 : vector<16x1xf32>
    %192 = math.rsqrt %191 : vector<16x1xf32>
    %193 = vector.broadcast %192 : vector<16x1xf32> to vector<16x32xf32>
    %194 = arith.mulf %189, %193 : vector<16x32xf32>
    %195 = vector.broadcast %171 : vector<1x32xf32> to vector<16x32xf32>
    %196 = arith.mulf %194, %195 : vector<16x32xf32>
    %197 = vector.broadcast %172 : vector<1x32xf32> to vector<16x32xf32>
    %198 = arith.addf %196, %197 : vector<16x32xf32>
    %199 = arith.truncf %198 : vector<16x32xf32> to vector<16x32xbf16>
    %c48 = arith.constant 48 : index
    %c0_52 = arith.constant 0 : index
    %200 = vector.load %arg1[%c48, %c0_52] : memref<240x128xbf16, #tpu.memory_space<vmem>>, vector<32x128xbf16>
    %c112 = arith.constant 112 : index
    %c0_53 = arith.constant 0 : index
    %201 = vector.load %arg1[%c112, %c0_53] : memref<240x128xbf16, #tpu.memory_space<vmem>>, vector<32x128xbf16>
    %cst_54 = arith.constant dense<0.000000e+00> : vector<16x128xf32>
    %202 = tpu.matmul %199, %200, %cst_54 {dimension_numbers = #tpu.dot_dimension_numbers<[1], [0], [0], [1], [0, 0, 1, 1], [], []>} : vector<16x32xbf16>, vector<32x128xbf16>, vector<16x128xf32> -> vector<16x128xf32>
    %cst_55 = arith.constant dense<0.000000e+00> : vector<16x128xf32>
    %203 = tpu.matmul %199, %201, %cst_55 {dimension_numbers = #tpu.dot_dimension_numbers<[1], [0], [0], [1], [0, 0, 1, 1], [], []>} : vector<16x32xbf16>, vector<32x128xbf16>, vector<16x128xf32> -> vector<16x128xf32>
    %cst_56 = arith.constant 0.000000e+00 : f32
    %204 = vector.broadcast %cst_56 : f32 to vector<16x32xf32>
    %205 = vector.extract_strided_slice %202 {offsets = [0, 0], sizes = [16, 32], strides = [1, 1]} : vector<16x128xf32> to vector<16x32xf32>
    %206 = arith.truncf %205 : vector<16x32xf32> to vector<16x32xbf16>
    %cst_57 = arith.constant dense<0.000000e+00> : vector<16x16xf32>
    %207 = tpu.matmul %206, %199, %cst_57 {dimension_numbers = #tpu.dot_dimension_numbers<[1], [1], [0], [0], [0, 0, 1, 0], [], []>} : vector<16x32xbf16>, vector<16x32xbf16>, vector<16x16xf32> -> vector<16x16xf32>
    %208 = arith.addf %207, %18 : vector<16x16xf32>
    %cst_58 = arith.constant dense<0xFF800000> : vector<16xf32>
    %209 = vector.multi_reduction <maximumf>, %208, %cst_58 [1] : vector<16x16xf32> to vector<16xf32>
    %210 = vector.shape_cast %209 : vector<16xf32> to vector<16x1xf32>
    %211 = vector.broadcast %210 : vector<16x1xf32> to vector<16x16xf32>
    %212 = arith.subf %208, %211 : vector<16x16xf32>
    %213 = math.exp %212 : vector<16x16xf32>
    %cst_59 = arith.constant dense<0.000000e+00> : vector<16xf32>
    %214 = vector.multi_reduction <add>, %213, %cst_59 [1] : vector<16x16xf32> to vector<16xf32>
    %215 = vector.shape_cast %214 : vector<16xf32> to vector<16x1xf32>
    %216 = tpu.reciprocal %215 {approx = true} : vector<16x1xf32> -> vector<16x1xf32>
    %217 = vector.broadcast %216 : vector<16x1xf32> to vector<16x16xf32>
    %218 = arith.mulf %213, %217 : vector<16x16xf32>
    %219 = vector.extract_strided_slice %203 {offsets = [0, 0], sizes = [16, 32], strides = [1, 1]} : vector<16x128xf32> to vector<16x32xf32>
    %220 = arith.truncf %219 : vector<16x32xf32> to vector<16x32xbf16>
    %221 = arith.truncf %218 : vector<16x16xf32> to vector<16x16xbf16>
    %cst_60 = arith.constant dense<0.000000e+00> : vector<16x32xf32>
    %222 = tpu.matmul %221, %220, %cst_60 {dimension_numbers = #tpu.dot_dimension_numbers<[1], [0], [0], [1], [0, 0, 1, 1], [], []>} : vector<16x16xbf16>, vector<16x32xbf16>, vector<16x32xf32> -> vector<16x32xf32>
    %223 = arith.addf %204, %222 : vector<16x32xf32>
    %224 = vector.extract_strided_slice %202 {offsets = [0, 32], sizes = [16, 32], strides = [1, 1]} : vector<16x128xf32> to vector<16x32xf32>
    %225 = arith.truncf %224 : vector<16x32xf32> to vector<16x32xbf16>
    %cst_61 = arith.constant dense<0.000000e+00> : vector<16x16xf32>
    %226 = tpu.matmul %225, %199, %cst_61 {dimension_numbers = #tpu.dot_dimension_numbers<[1], [1], [0], [0], [0, 0, 1, 0], [], []>} : vector<16x32xbf16>, vector<16x32xbf16>, vector<16x16xf32> -> vector<16x16xf32>
    %227 = arith.addf %226, %18 : vector<16x16xf32>
    %cst_62 = arith.constant dense<0xFF800000> : vector<16xf32>
    %228 = vector.multi_reduction <maximumf>, %227, %cst_62 [1] : vector<16x16xf32> to vector<16xf32>
    %229 = vector.shape_cast %228 : vector<16xf32> to vector<16x1xf32>
    %230 = vector.broadcast %229 : vector<16x1xf32> to vector<16x16xf32>
    %231 = arith.subf %227, %230 : vector<16x16xf32>
    %232 = math.exp %231 : vector<16x16xf32>
    %cst_63 = arith.constant dense<0.000000e+00> : vector<16xf32>
    %233 = vector.multi_reduction <add>, %232, %cst_63 [1] : vector<16x16xf32> to vector<16xf32>
    %234 = vector.shape_cast %233 : vector<16xf32> to vector<16x1xf32>
    %235 = tpu.reciprocal %234 {approx = true} : vector<16x1xf32> -> vector<16x1xf32>
    %236 = vector.broadcast %235 : vector<16x1xf32> to vector<16x16xf32>
    %237 = arith.mulf %232, %236 : vector<16x16xf32>
    %238 = vector.extract_strided_slice %203 {offsets = [0, 32], sizes = [16, 32], strides = [1, 1]} : vector<16x128xf32> to vector<16x32xf32>
    %239 = arith.truncf %238 : vector<16x32xf32> to vector<16x32xbf16>
    %240 = arith.truncf %237 : vector<16x16xf32> to vector<16x16xbf16>
    %cst_64 = arith.constant dense<0.000000e+00> : vector<16x32xf32>
    %241 = tpu.matmul %240, %239, %cst_64 {dimension_numbers = #tpu.dot_dimension_numbers<[1], [0], [0], [1], [0, 0, 1, 1], [], []>} : vector<16x16xbf16>, vector<16x32xbf16>, vector<16x32xf32> -> vector<16x32xf32>
    %242 = arith.addf %223, %241 : vector<16x32xf32>
    %243 = vector.extract_strided_slice %202 {offsets = [0, 64], sizes = [16, 32], strides = [1, 1]} : vector<16x128xf32> to vector<16x32xf32>
    %244 = arith.truncf %243 : vector<16x32xf32> to vector<16x32xbf16>
    %cst_65 = arith.constant dense<0.000000e+00> : vector<16x16xf32>
    %245 = tpu.matmul %244, %199, %cst_65 {dimension_numbers = #tpu.dot_dimension_numbers<[1], [1], [0], [0], [0, 0, 1, 0], [], []>} : vector<16x32xbf16>, vector<16x32xbf16>, vector<16x16xf32> -> vector<16x16xf32>
    %246 = arith.addf %245, %18 : vector<16x16xf32>
    %cst_66 = arith.constant dense<0xFF800000> : vector<16xf32>
    %247 = vector.multi_reduction <maximumf>, %246, %cst_66 [1] : vector<16x16xf32> to vector<16xf32>
    %248 = vector.shape_cast %247 : vector<16xf32> to vector<16x1xf32>
    %249 = vector.broadcast %248 : vector<16x1xf32> to vector<16x16xf32>
    %250 = arith.subf %246, %249 : vector<16x16xf32>
    %251 = math.exp %250 : vector<16x16xf32>
    %cst_67 = arith.constant dense<0.000000e+00> : vector<16xf32>
    %252 = vector.multi_reduction <add>, %251, %cst_67 [1] : vector<16x16xf32> to vector<16xf32>
    %253 = vector.shape_cast %252 : vector<16xf32> to vector<16x1xf32>
    %254 = tpu.reciprocal %253 {approx = true} : vector<16x1xf32> -> vector<16x1xf32>
    %255 = vector.broadcast %254 : vector<16x1xf32> to vector<16x16xf32>
    %256 = arith.mulf %251, %255 : vector<16x16xf32>
    %257 = vector.extract_strided_slice %203 {offsets = [0, 64], sizes = [16, 32], strides = [1, 1]} : vector<16x128xf32> to vector<16x32xf32>
    %258 = arith.truncf %257 : vector<16x32xf32> to vector<16x32xbf16>
    %259 = arith.truncf %256 : vector<16x16xf32> to vector<16x16xbf16>
    %cst_68 = arith.constant dense<0.000000e+00> : vector<16x32xf32>
    %260 = tpu.matmul %259, %258, %cst_68 {dimension_numbers = #tpu.dot_dimension_numbers<[1], [0], [0], [1], [0, 0, 1, 1], [], []>} : vector<16x16xbf16>, vector<16x32xbf16>, vector<16x32xf32> -> vector<16x32xf32>
    %261 = arith.addf %242, %260 : vector<16x32xf32>
    %262 = vector.extract_strided_slice %202 {offsets = [0, 96], sizes = [16, 32], strides = [1, 1]} : vector<16x128xf32> to vector<16x32xf32>
    %263 = arith.truncf %262 : vector<16x32xf32> to vector<16x32xbf16>
    %cst_69 = arith.constant dense<0.000000e+00> : vector<16x16xf32>
    %264 = tpu.matmul %263, %199, %cst_69 {dimension_numbers = #tpu.dot_dimension_numbers<[1], [1], [0], [0], [0, 0, 1, 0], [], []>} : vector<16x32xbf16>, vector<16x32xbf16>, vector<16x16xf32> -> vector<16x16xf32>
    %265 = arith.addf %264, %18 : vector<16x16xf32>
    %cst_70 = arith.constant dense<0xFF800000> : vector<16xf32>
    %266 = vector.multi_reduction <maximumf>, %265, %cst_70 [1] : vector<16x16xf32> to vector<16xf32>
    %267 = vector.shape_cast %266 : vector<16xf32> to vector<16x1xf32>
    %268 = vector.broadcast %267 : vector<16x1xf32> to vector<16x16xf32>
    %269 = arith.subf %265, %268 : vector<16x16xf32>
    %270 = math.exp %269 : vector<16x16xf32>
    %cst_71 = arith.constant dense<0.000000e+00> : vector<16xf32>
    %271 = vector.multi_reduction <add>, %270, %cst_71 [1] : vector<16x16xf32> to vector<16xf32>
    %272 = vector.shape_cast %271 : vector<16xf32> to vector<16x1xf32>
    %273 = tpu.reciprocal %272 {approx = true} : vector<16x1xf32> -> vector<16x1xf32>
    %274 = vector.broadcast %273 : vector<16x1xf32> to vector<16x16xf32>
    %275 = arith.mulf %270, %274 : vector<16x16xf32>
    %276 = vector.extract_strided_slice %203 {offsets = [0, 96], sizes = [16, 32], strides = [1, 1]} : vector<16x128xf32> to vector<16x32xf32>
    %277 = arith.truncf %276 : vector<16x32xf32> to vector<16x32xbf16>
    %278 = arith.truncf %275 : vector<16x16xf32> to vector<16x16xbf16>
    %cst_72 = arith.constant dense<0.000000e+00> : vector<16x32xf32>
    %279 = tpu.matmul %278, %277, %cst_72 {dimension_numbers = #tpu.dot_dimension_numbers<[1], [0], [0], [1], [0, 0, 1, 1], [], []>} : vector<16x16xbf16>, vector<16x32xbf16>, vector<16x32xf32> -> vector<16x32xf32>
    %280 = arith.addf %261, %279 : vector<16x32xf32>
    %281 = arith.addf %168, %280 : vector<16x32xf32>
    %cst_73 = arith.constant dense<0.000000e+00> : vector<16xf32>
    %282 = vector.multi_reduction <add>, %281, %cst_73 [1] : vector<16x32xf32> to vector<16xf32>
    %283 = vector.shape_cast %282 : vector<16xf32> to vector<16x1xf32>
    %cst_74 = arith.constant 3.200000e+01 : f32
    %284 = vector.broadcast %cst_74 : f32 to vector<16x1xf32>
    %285 = arith.divf %283, %284 : vector<16x1xf32>
    %286 = vector.broadcast %285 : vector<16x1xf32> to vector<16x32xf32>
    %287 = arith.subf %281, %286 : vector<16x32xf32>
    %288 = arith.mulf %287, %287 : vector<16x32xf32>
    %cst_75 = arith.constant dense<0.000000e+00> : vector<16xf32>
    %289 = vector.multi_reduction <add>, %288, %cst_75 [1] : vector<16x32xf32> to vector<16xf32>
    %290 = vector.shape_cast %289 : vector<16xf32> to vector<16x1xf32>
    %cst_76 = arith.constant 3.200000e+01 : f32
    %291 = vector.broadcast %cst_76 : f32 to vector<16x1xf32>
    %292 = arith.divf %290, %291 : vector<16x1xf32>
    %293 = vector.broadcast %285 : vector<16x1xf32> to vector<16x32xf32>
    %294 = arith.subf %281, %293 : vector<16x32xf32>
    %cst_77 = arith.constant 9.99999974E-6 : f32
    %295 = vector.broadcast %cst_77 : f32 to vector<16x1xf32>
    %296 = arith.addf %292, %295 : vector<16x1xf32>
    %297 = math.rsqrt %296 : vector<16x1xf32>
    %298 = vector.broadcast %297 : vector<16x1xf32> to vector<16x32xf32>
    %299 = arith.mulf %294, %298 : vector<16x32xf32>
    %300 = vector.broadcast %173 : vector<1x32xf32> to vector<16x32xf32>
    %301 = arith.mulf %299, %300 : vector<16x32xf32>
    %302 = vector.broadcast %174 : vector<1x32xf32> to vector<16x32xf32>
    %303 = arith.addf %301, %302 : vector<16x32xf32>
    %304 = arith.truncf %303 : vector<16x32xf32> to vector<16x32xbf16>
    %cst_78 = arith.constant dense<0.000000e+00> : vector<16x128xf32>
    %305 = tpu.matmul %304, %19, %cst_78 {dimension_numbers = #tpu.dot_dimension_numbers<[1], [0], [0], [1], [0, 0, 1, 1], [], []>} : vector<16x32xbf16>, vector<32x128xbf16>, vector<16x128xf32> -> vector<16x128xf32>
    %306 = vector.extract_strided_slice %305 {offsets = [0, 32], sizes = [16, 32], strides = [1, 1]} : vector<16x128xf32> to vector<16x32xf32>
    %307 = vector.broadcast %175 : vector<1x32xf32> to vector<16x32xf32>
    %308 = arith.addf %306, %307 : vector<16x32xf32>
    %cst_79 = arith.constant 0.000000e+00 : f32
    %309 = vector.broadcast %cst_79 : f32 to vector<16x32xf32>
    %310 = arith.maximumf %308, %309 : vector<16x32xf32>
    %311 = arith.truncf %310 : vector<16x32xf32> to vector<16x32xbf16>
    %cst_80 = arith.constant dense<0.000000e+00> : vector<16x128xf32>
    %312 = tpu.matmul %311, %20, %cst_80 {dimension_numbers = #tpu.dot_dimension_numbers<[1], [0], [0], [1], [0, 0, 1, 1], [], []>} : vector<16x32xbf16>, vector<32x128xbf16>, vector<16x128xf32> -> vector<16x128xf32>
    %313 = vector.extract_strided_slice %312 {offsets = [0, 32], sizes = [16, 32], strides = [1, 1]} : vector<16x128xf32> to vector<16x32xf32>
    %314 = vector.broadcast %176 : vector<1x32xf32> to vector<16x32xf32>
    %315 = arith.addf %313, %314 : vector<16x32xf32>
    %316 = arith.addf %281, %315 : vector<16x32xf32>
    %317 = math.tanh %316 : vector<16x32xf32>
    %318 = arith.truncf %317 : vector<16x32xf32> to vector<16x32xbf16>
    %c208 = arith.constant 208 : index
    %c0_81 = arith.constant 0 : index
    %319 = vector.load %arg1[%c208, %c0_81] : memref<240x128xbf16, #tpu.memory_space<vmem>>, vector<32x128xbf16>
    %cst_82 = arith.constant dense<0.000000e+00> : vector<16x128xf32>
    %320 = tpu.matmul %318, %319, %cst_82 {dimension_numbers = #tpu.dot_dimension_numbers<[1], [0], [0], [1], [0, 0, 1, 1], [], []>} : vector<16x32xbf16>, vector<32x128xbf16>, vector<16x128xf32> -> vector<16x128xf32>
    %c32 = arith.constant 32 : index
    %c0_83 = arith.constant 0 : index
    %321 = vector.load %arg2[%c32, %c0_83] : memref<208x128xf32, #tpu.memory_space<vmem>>, vector<16x128xf32>
    %322 = arith.mulf %320, %321 : vector<16x128xf32>
    %c176_84 = arith.constant 176 : index
    %c0_85 = arith.constant 0 : index
    %323 = vector.load %arg2[%c176_84, %c0_85] : memref<208x128xf32, #tpu.memory_space<vmem>>, vector<2x16xf32>
    %cst_86 = arith.constant dense<0.000000e+00> : vector<2x128xf32>
    %324 = tpu.matmul %323, %322, %cst_86 {dimension_numbers = #tpu.dot_dimension_numbers<[1], [0], [0], [1], [0, 0, 1, 1], [], []>} : vector<2x16xf32>, vector<16x128xf32>, vector<2x128xf32> -> vector<2x128xf32>
    %c48_87 = arith.constant 48 : index
    %c0_88 = arith.constant 0 : index
    %325 = vector.load %arg2[%c48_87, %c0_88] : memref<208x128xf32, #tpu.memory_space<vmem>>, vector<128x16xf32>
    %cst_89 = arith.constant dense<0.000000e+00> : vector<2x16xf32>
    %326 = tpu.matmul %324, %325, %cst_89 {dimension_numbers = #tpu.dot_dimension_numbers<[1], [0], [0], [1], [0, 0, 1, 1], [], []>} : vector<2x128xf32>, vector<128x16xf32>, vector<2x16xf32> -> vector<2x16xf32>
    %c200 = arith.constant 200 : index
    %c0_90 = arith.constant 0 : index
    %327 = vector.load %arg2[%c200, %c0_90] : memref<208x128xf32, #tpu.memory_space<vmem>>, vector<1x16xf32>
    %328 = vector.broadcast %327 : vector<1x16xf32> to vector<2x16xf32>
    %329 = arith.addf %326, %328 : vector<2x16xf32>
    %c0_91 = arith.constant 0 : index
    %c0_92 = arith.constant 0 : index
    %330 = vector.load %arg3[%c0_91, %c0_92] : memref<2x16xf32, #tpu.memory_space<vmem>>, vector<2x16xf32>
    tpu.vector_store %arg3[%c0_91, %c0_92], %329 {strides = array<i32>} : memref<2x16xf32, #tpu.memory_space<vmem>>, vector<2x16xf32>,
    return
  }
}

</mosaic_0001>

<bundles_post_ra>
// kernel: fwd.1
= control target key start
LH: loop header
LB: loop body
LE: loop exit
PB: predicated region body
PF: predicated region fallthrough
CT: control target
= control target key end

     0   :  { %8 = vsyncpa [#allocation3], 0  ;;  %s2891_s0 = inlined_call_operand.vmem [shape: s32[16,1], index: 0, kind: input, shape index: {}]   ;;  %s2892_s1 = inlined_call_operand.hbm [shape: bf16[240,128], index: 1, kind: input, shape index: {}]   ;;  %s2893_s2 = inlined_call_operand.hbm [shape: f32[208,128], index: 2, kind: input, shape index: {}]   ;;  %s2894_s3 = inlined_call_operand.hbm [shape: f32[2,16], index: 3, kind: output, shape index: {}]  }
   0x1   :  { %9 = vsyncpa [#allocation6], 0 }
   0x2   :  { %10 = vsyncpa [#allocation4], 0  ;;  %s2503_s12 = smov [#allocation2]  }
   0x3   :  { %s18_s13 = sshll.u32 %s2503_s12, 4  ;;  %s19_s13 = int_to_ptr.vmem [resolvable:$true] %s18_s13 }
   0x4   :  { %s2445_s14 = scalar_lea.vmem %s19_s13, 1920  ;;  %p2450_p1 = scmp.lt.s32.totalorder %s19_s13, %s19_s13 }
   0x5   :  { %p2446_p0 = scmp.ne.s32.totalorder %s19_s13, %s2445_s14  ;;  %p2451_p2 = scmp.lt.s32.totalorder %s2445_s14, %s2445_s14 }
   0x7   :  { %p2452_p3 = por %p2451_p2, %p2450_p1 }
   0x9   :  { %p2453_p4 = pnand %p2452_p3, %p2446_p0 }
   0xb   :  { %2456 = shalt.err (!%p2453_p4)
}
   0xc   :  { %s2504_s15 = smov 64   ;;  %s2505_s16 = smov 4  }
   0xd   :  { %24 = dma.hbm_to_vmem [thread:$0]  %s2892_s1, 1920, %s19_s13, [#allocation3], %s2504_s15, %s2504_s15, %s2505_s16  }
   0xe   :  { %s2506_s19 = smov [#allocation5]  }
   0xf   :  { %s30_s20 = sshll.u32 %s2506_s19, 4  ;;  %s31_s20 = int_to_ptr.vmem [resolvable:$true] %s30_s20 }
  0x10   :  { %s2465_s21 = scalar_lea.vmem %s31_s20, 3328  ;;  %p2470_p6 = scmp.lt.s32.totalorder %s31_s20, %s31_s20 }
  0x11   :  { %p2466_p5 = scmp.ne.s32.totalorder %s31_s20, %s2465_s21  ;;  %p2471_p7 = scmp.lt.s32.totalorder %s2465_s21, %s2465_s21 }
  0x13   :  { %p2472_p8 = por %p2471_p7, %p2470_p6 }
  0x15   :  { %p2473_p9 = pnand %p2472_p8, %p2466_p5 }
  0x17   :  { %2476 = shalt.err (!%p2473_p9)
}
  0x18   :  { %s2507_s22 = smov 128   ;;  %s2508_s23 = smov 8  }
  0x19   :  { %36 = dma.hbm_to_vmem [thread:$0]  %s2893_s2, 3328, %s31_s20, [#allocation6], %s2507_s22, %s2507_s22, %s2508_s23  }
  0x1a   :  { %2497 = dma.done.wait [#allocation3], 1920  }
  0x1b   :  { %2498 = vsyncadd [#allocation3], 4294965376 }
  0x1c   :  { %2499 = dma.done.wait [#allocation6], 3328  }
  0x1d   :  { %2500 = vsyncadd [#allocation6], 4294963968  ;;  %v2509_v0 = vmov 0   ;;  %v2510_v1 = vmov 0.0   ;;  %v44_v2 = vld [vmem:[%s2891_s0] sm:$0xff]  ;;  %v45_v3 = vld [vmem:[%s2891_s0 + $0x8] sm:$0xff]  ;;  %v46_v8 = vlaneseq }
  0x1e   :  { %2331 = vset.pattern.permute.xlu0 %v2509_v0  ;;  %2103 = vmatprep.subr.bf16.mxu0 %v2510_v1  ;;  %vm116_vm0 = vcmp.ne.s32.totalorder %v44_v2, 0  ;;  %vm117_vm1 = vcmp.ne.s32.totalorder %v45_v3, 0  ;;  %v2338_v4 = vld [vmem:[#allocation2] sm:$0xff]   ;;  %vm2511_vm2 = vmmov 0   ;;  %vm69_vm5 = vcmask 130048   ;;  %v114_v17 = vld [vmem:[#allocation5] sm:$0xff] }
  0x1f   :  { %2332 = vset.pattern.permute.xlu1 %v2509_v0  ;;  %2137 = vmatprep.subr.bf16.mxu1 %v2510_v1  ;;  %v1975_v5 = vsel %vm116_vm0, 1.0, %v2510_v1  ;;  %v1976_v6 = vsel %vm117_vm1, 1.0, %v2510_v1  ;;  %v47_v9 = vand.u32 127, %v46_v8  ;;  %v115_v20 = vld [vmem:[#allocation5 + $0x8] sm:$0xff]  ;;  %vm148_vm6 = vcmask 261120   ;;  %s2512_s0 = smov 96  }
  0x20   :  { %49 = vperm.xlu0 %2331, %v44_v2   ;;  %2104 = vmatpush3.bf16.msra.mxu0 %v2338_v4  ;;  %v2333_v7 = vpack.i.bf16 %v1976_v6, %v1975_v5  ;;  %v2575_v40 = vld [vmem:[#allocation5 + $0xb8] ss:$0 sm:$0xff]  ;;  %v2340_v42 = vld [vmem:[#allocation2 + $0x8] sm:$0xff]   ;;  %s2513_s2 = smov 32   ;;  %s2514_s29 = smov [#allocation7]   ;;  %vm1953_vm7 = vcmask 123904  }
  0x21   :  { %2105 = vmatprep.mubr.msk.bf16.mxu0 %vm2511_vm2, %v2510_v1  ;;  %2109 = vmatprep.subr.bf16.mxu0 %v2510_v1  ;;  %v2339_v41 = vld [vmem:[#allocation2 + $0x10] sm:$0xff]   ;;  %v2342_v60 = vld [vmem:[#allocation2 + $0x28] sm:$0xff]   ;;  %s1961_s30 = sshll.u32 %s2514_s29, 4  ;;  %s1962_s30 = int_to_ptr.vmem [resolvable:$true] %s1961_s30 }
  0x22   :  { %2139 = vmatprep.mubr.msk.bf16.mxu1 %vm2511_vm2, %v2510_v1  ;;  %2334 = vperm.xlu1 %2332, %v2333_v7   ;;  %v2341_v58 = vld [vmem:[#allocation2 + $0x30] sm:$0xff]   ;;  %s2477_s4 = scalar_lea.vmem %s1962_s30, 32  ;;  %p2482_p11 = scmp.lt.s32.totalorder %s1962_s30, %s1962_s30 }
  0x23   :  { %p2478_p10 = scmp.ne.s32.totalorder %s1962_s30, %s2477_s4  ;;  %p2483_p12 = scmp.lt.s32.totalorder %s2477_s4, %s2477_s4 }
  0x24   :  { %52 = vperm.xlu0 %2331, %v45_v3  }
  0x25   :  { %p2484_p13 = por %p2483_p12, %p2482_p11 }
  0x27   :  { %p2485_p0 = pnand %p2484_p13, %p2478_p10 }
  0x9b   :  { %v50_v10 = vpop.permute.xlu0 %49 }
  0x9c   :  { %vm54_vm3 = vcmp.eq.s32.totalorder %v50_v10, %v47_v9 }
  0x9d   :  { %v1971_v12 = vsel %vm54_vm3, 1.0, %v2510_v1  ;;  %v2335_v15 = vpop.permute.xlu1 %2334 }
  0x9e   :  { %v2336_v16 = vunpack.i.l.bf16 %v2335_v15  ;;  %v2337_v18 = vunpack.i.h.bf16 %v2335_v15 }
  0x9f   :  { %v53_v11 = vpop.permute.xlu0 %52 }
  0xa0   :  { %vm55_vm4 = vcmp.eq.s32.totalorder %v53_v11, %v47_v9  ;;  %v132_v19 = vmul.f32 %v2336_v16, %v114_v17  ;;  %v133_v23 = vmul.f32 %v2337_v18, %v115_v20 }
  0xa1   :  { %v1972_v13 = vsel %vm55_vm4, 1.0, %v2510_v1 }
  0xa2   :  { %v60_v14 = vpack.c.bf16 %v1972_v13, %v1971_v12 }
  0xa4   :  { %2106 = vmatmul.mubr.msk.bf16.vlgmr.msra.gmra.mxu0 %vm69_vm5, %v60_v14  ;;  %v2609_v14 = vld [vmem:[#allocation5 + $0x10] sm:$0xff] }
  0xa5   :  { %2113 = vmatprep.mubr.msk.bf16.mxu0 %vm2511_vm2, %v2510_v1  ;;  %2110 = vmatpush3.bf16.msra.mxu0 %v2339_v41 }
  0xa6   :  { %2111 = vmatprep.subr.bf16.mxu0 %v2510_v1 }
  0xa9   :  { %2112 = vmatpush3.bf16.msra.mxu0 %v2340_v42 }
  0xaa   :  { %2117 = vmatprep.subr.bf16.mxu0 %v2510_v1 }
 0x164   :  { %v107_v21 = vpop.f32.mrf.mxu0 }
 0x165   :  { %v2563_v22 = vadd.f32 %v132_v19, %v107_v21  ;;  %v2613_v19 = vld [vmem:[#allocation5 + $0x18] sm:$0xff] }
 0x166   :  { %v2107_v24 = vpop.f32.mrf.mxu0 }
 0x167   :  { %v149_v25 = vsel %vm148_vm6, %v2563_v22, 0.0 }
 0x168   :  { %v110_v26 = vpop.f32.mrf.mxu0  ;;  %150 = vadd.xlane.f32.xlu1 %v149_v25 }
 0x169   :  { %v2567_v27 = vadd.f32 %v133_v23, %v110_v26 }
 0x16a   :  { %v2108_v28 = vpop.f32.mrf.mxu0 }
 0x16b   :  { %v152_v29 = vsel %vm148_vm6, %v2567_v27, 0.0 }
 0x16c   :  { %153 = vadd.xlane.f32.xlu0 %v152_v29 }
 0x1f1   :  { %v151_v30 = vpop.xlane.xlu1 %150 }
 0x1f2   :  { %v156_v31 = vmul.f32 0.03125, %v151_v30 }
 0x1f4   :  { %v158_v32 = vsub.f32 %v2563_v22, %v156_v31 }
 0x1f5   :  { %v154_v33 = vpop.xlane.xlu0 %153 }
 0x1f6   :  { %v157_v34 = vmul.f32 0.03125, %v154_v33  ;;  %v160_v35 = vmul.f32 %v158_v32, %v158_v32 }
 0x1f8   :  { %v159_v36 = vsub.f32 %v2567_v27, %v157_v34  ;;  %v162_v37 = vsel %vm148_vm6, %v160_v35, 0.0 }
 0x1f9   :  { %163 = vadd.xlane.f32.xlu0 %v162_v37 }
 0x1fa   :  { %v161_v38 = vmul.f32 %v159_v36, %v159_v36 }
 0x1fc   :  { %v165_v39 = vsel %vm148_vm6, %v161_v38, 0.0 }
 0x1fd   :  { %166 = vadd.xlane.f32.xlu1 %v165_v39 }
 0x20f   :  { %183 = vrot.lane.b32.xlu0 %v2575_v40, %s2512_s0 }
 0x282   :  { %v164_v43 = vpop.xlane.xlu0 %163 }
 0x283   :  { %v168_v44 = vmul.f32 0.03125, %v164_v43 }
 0x285   :  { %v170_v45 = vadd.f32 1e-05, %v168_v44 }
 0x286   :  { %v167_v46 = vpop.xlane.xlu1 %166  ;;  %v184_v54 = vpop.permute.xlu0 %183 }
 0x287   :  { %2353 = vrsqrt.f32 %v170_v45  ;;  %v169_v47 = vmul.f32 0.03125, %v167_v46 }
 0x289   :  { %v171_v48 = vadd.f32 1e-05, %v169_v47 }
 0x28b   :  { %2355 = vrsqrt.f32 %v171_v48 }
 0x294   :  { %v2354_v49 = vpop.eup %2353 }
 0x295   :  { %v174_v50 = vmul.f32 %v2354_v49, %v158_v32 }
 0x297   :  { %v180_v52 = vmul.f32 %v2575_v40, %v174_v50 }
 0x298   :  { %v2356_v51 = vpop.eup %2355 }
 0x299   :  { %v175_v53 = vmul.f32 %v2356_v51, %v159_v36  ;;  %v186_v56 = vadd.f32 %v184_v54, %v180_v52 }
 0x29b   :  { %v181_v55 = vmul.f32 %v2575_v40, %v175_v53 }
 0x29d   :  { %v187_v57 = vadd.f32 %v184_v54, %v181_v55 }
 0x29f   :  { %v188_v59 = vpack.c.bf16 %v187_v57, %v186_v56 }
 0x2a1   :  { %2114 = vmatmul.mubr.msk.bf16.vlgmr.msra.gmra.mxu0 %vm148_vm6, %v188_v59  ;;  %v2590_v61 = vsel %vm148_vm6, %v188_v59, 0 }
 0x2a2   :  { %2118 = vmatpush3.bf16.msra.mxu0 %v2341_v58  ;;  %2121 = vmatprep.mubr.msk.bf16.mxu0 %vm2511_vm2, %v2510_v1 }
 0x2a3   :  { %2119 = vmatprep.subr.bf16.mxu0 %v2510_v1 }
 0x2a6   :  { %2120 = vmatpush3.bf16.msra.mxu0 %v2342_v60 }
 0x2a7   :  { %2125 = vmatprep.subr.bf16.mxu0 %v2510_v1 }
 0x2a9   :  { %2122 = vmatmul.mubr.msk.bf16.vlgmr.msra.gmra.mxu0 %vm148_vm6, %v188_v59 }
 0x2aa   :  { %2126 = vmatpush3.bf16.xpose.msra.mxu0 %v2590_v61  ;;  %2127 = vmatprep.mubr.msk.bf16.mxu0 %vm2511_vm2, %v2510_v1 }
 0x2ab   :  { %2131 = vmatprep.subr.bf16.mxu0 %v2510_v1 }
 0x361   :  { %v246_v62 = vpop.f32.mrf.mxu0 }
 0x363   :  { %v2115_v63 = vpop.f32.mrf.mxu0 }
 0x365   :  { %v249_v0 = vpop.f32.mrf.mxu0 }
 0x366   :  { %v306_v2 = vpack.c.bf16 %v249_v0, %v246_v62 }
 0x367   :  { %v2116_v3 = vpop.f32.mrf.mxu0 }
 0x368   :  { %376 = vrot.lane.b32.xlu1 %v306_v2, %s2512_s0  ;;  %2128 = vmatmul.mubr.msk.bf16.vlgmr.msra.gmra.mxu0 %vm148_vm6, %v306_v2 }
 0x369   :  { %2132 = vmatpush3.bf16.xpose.msra.mxu0 %v2590_v61  ;;  %v299_v4 = vpop.f32.mrf.mxu0  ;;  %2133 = vmatprep.mubr.msk.bf16.mxu0 %vm2511_vm2, %v2510_v1 }
 0x36a   :  { %2143 = vmatprep.subr.bf16.mxu0 %v2510_v1 }
 0x36b   :  { %v2123_v5 = vpop.f32.mrf.mxu0 }
 0x36d   :  { %v302_v6 = vpop.f32.mrf.mxu0 }
 0x36e   :  { %v2602_v7 = vpack.c.bf16 %v302_v6, %v299_v4 }
 0x36f   :  { %v2124_v8 = vpop.f32.mrf.mxu0 }
 0x3da   :  { %v377_v9 = vpop.permute.xlu1 %376 }
 0x3db   :  { %2134 = vmatmul.mubr.msk.bf16.vlgmr.msra.gmra.mxu0 %vm148_vm6, %v377_v9 }
 0x3dc   :  { %2144 = vmatpush3.bf16.msra.mxu0 %v2602_v7  ;;  %2145 = vmatprep.mubr.msk.bf16.mxu0 %vm2511_vm2, %v2510_v1 }
 0x3dd   :  { %2155 = vmatprep.subr.bf16.mxu0 %v2510_v1 }
 0x428   :  { %v344_v10 = vpop.f32.mrf.mxu0 }
 0x429   :  { %v345_v36 = vadd.f32 %v344_v10, %v2609_v14 }
 0x42a   :  { %v2129_v11 = vpop.f32.mrf.mxu0 }
 0x42b   :  { %v351_v37 = vsel %vm69_vm5, %v345_v36, -inf }
 0x42c   :  { %v347_v12 = vpop.f32.mrf.mxu0 }
 0x42d   :  { %v348_v38 = vadd.f32 %v347_v12, %v2613_v19 }
 0x42e   :  { %v2130_v13 = vpop.f32.mrf.mxu0 }
 0x42f   :  { %v354_v39 = vsel %vm69_vm5, %v348_v38, -inf }
 0x49b   :  { %v415_v15 = vpop.f32.mrf.mxu0 }
 0x49c   :  { %v416_v16 = vadd.f32 %v415_v15, %v2609_v14 }
 0x49d   :  { %v2135_v17 = vpop.f32.mrf.mxu0 }
 0x49e   :  { %v422_v18 = vsel %vm69_vm5, %v416_v16, -inf }
 0x49f   :  { %423 = vmax.xlane.f32.xlu1 %v422_v18  ;;  %v418_v20 = vpop.f32.mrf.mxu0 }
 0x4a0   :  { %v419_v21 = vadd.f32 %v418_v20, %v2613_v19 }
 0x4a1   :  { %v2136_v23 = vpop.f32.mrf.mxu0 }
 0x4a2   :  { %v425_v24 = vsel %vm69_vm5, %v419_v21, -inf }
 0x4a3   :  { %426 = vmax.xlane.f32.xlu0 %v425_v24 }
 0x528   :  { %v424_v25 = vpop.xlane.xlu1 %423 }
 0x529   :  { %v428_v26 = vsub.f32 %v416_v16, %v424_v25 }
 0x52b   :  { %v430_v28 = vmul.f32 1.442695, %v428_v26 }
 0x52c   :  { %v427_v29 = vpop.xlane.xlu0 %426 }
 0x52d   :  { %2357 = vpow2.f32 %v430_v28  ;;  %v429_v30 = vsub.f32 %v419_v21, %v427_v29 }
 0x52f   :  { %v432_v31 = vmul.f32 1.442695, %v429_v30 }
 0x531   :  { %2359 = vpow2.f32 %v432_v31 }
 0x53a   :  { %v2358_v32 = vpop.eup %2357 }
 0x53b   :  { %v434_v33 = vsel %vm69_vm5, %v2358_v32, 0.0 }
 0x53c   :  { %435 = vadd.xlane.f32.xlu0 %v434_v33 }
 0x53e   :  { %v2360_v34 = vpop.eup %2359 }
 0x53f   :  { %v437_v35 = vsel %vm69_vm5, %v2360_v34, 0.0 }
 0x540   :  { %438 = vadd.xlane.f32.xlu1 %v437_v35 }
 0x551   :  { %537 = vrot.lane.b32.xlu1 %v306_v2, %s2504_s15 }
 0x552   :  { %446 = vrot.lane.b32.xlu0 %v2602_v7, %s2512_s0 }
 0x555   :  { %655 = vrot.lane.b32.xlu1 %v306_v2, %s2513_s2 }
 0x571   :  { %352 = vmax.xlane.f32.xlu0 %v351_v37 }
 0x579   :  { %355 = vmax.xlane.f32.xlu1 %v354_v39 }
 0x5c5   :  { %v436_v41 = vpop.xlane.xlu0 %435 }
 0x5c6   :  { %2361 = vrcp.f32 %v436_v41 }
 0x5c9   :  { %v439_v42 = vpop.xlane.xlu1 %438  ;;  %v447_v43 = vpop.permute.xlu0 %446 }
 0x5ca   :  { %2363 = vrcp.f32 %v439_v42  ;;  %2138 = vmatpush3.bf16.msra.mxu1 %v447_v43 }
 0x5cb   :  { %2149 = vmatprep.subr.bf16.mxu1 %v2510_v1 }
 0x5cd   :  { %v538_v49 = vpop.permute.xlu1 %537 }
 0x5d1   :  { %v656_v50 = vpop.permute.xlu1 %655 }
 0x5d3   :  { %v2362_v44 = vpop.eup %2361 }
 0x5d4   :  { %v442_v46 = vmul.f32 %v2362_v44, %v2358_v32 }
 0x5d7   :  { %v2364_v45 = vpop.eup %2363 }
 0x5d8   :  { %v443_v47 = vmul.f32 %v2364_v45, %v2360_v34 }
 0x5da   :  { %v444_v48 = vpack.c.bf16 %v443_v47, %v442_v46 }
 0x5dc   :  { %2140 = vmatmul.mubr.msk.bf16.vlgmr.msra.gmra.mxu1 %vm69_vm5, %v444_v48 }
 0x5dd   :  { %2150 = vmatpush3.bf16.xpose.msra.mxu1 %v2590_v61  ;;  %2151 = vmatprep.mubr.msk.bf16.mxu1 %vm2511_vm2, %v2510_v1 }
 0x5de   :  { %2161 = vmatprep.subr.bf16.mxu1 %v2510_v1 }
 0x5e4   :  { %2152 = vmatmul.mubr.msk.bf16.vlgmr.msra.gmra.mxu1 %vm148_vm6, %v538_v49 }
 0x5e5   :  { %2162 = vmatpush3.bf16.xpose.msra.mxu1 %v2590_v61  ;;  %2163 = vmatprep.mubr.msk.bf16.mxu1 %vm2511_vm2, %v2510_v1 }
 0x5e6   :  { %2173 = vmatprep.subr.bf16.mxu1 %v2510_v1 }
 0x5ec   :  { %2164 = vmatmul.mubr.msk.bf16.vlgmr.msra.gmra.mxu1 %vm148_vm6, %v656_v50 }
 0x5ed   :  { %2177 = vmatprep.mubr.msk.bf16.mxu1 %vm2511_vm2, %v2510_v1 }
 0x5fa   :  { %v353_v51 = vpop.xlane.xlu0 %352 }
 0x5fb   :  { %v357_v52 = vsub.f32 %v345_v36, %v353_v51 }
 0x5fd   :  { %v359_v56 = vmul.f32 1.442695, %v357_v52 }
 0x5ff   :  { %2365 = vpow2.f32 %v359_v56 }
 0x602   :  { %v356_v53 = vpop.xlane.xlu1 %355 }
 0x603   :  { %v358_v57 = vsub.f32 %v348_v38, %v356_v53 }
 0x605   :  { %v361_v60 = vmul.f32 1.442695, %v358_v57 }
 0x607   :  { %2367 = vpow2.f32 %v361_v60 }
 0x60c   :  { %v2366_v11 = vpop.eup %2365 }
 0x60d   :  { %v363_v17 = vsel %vm69_vm5, %v2366_v11, 0.0 }
 0x614   :  { %v2368_v18 = vpop.eup %2367 }
 0x615   :  { %v366_v20 = vsel %vm69_vm5, %v2368_v18, 0.0 }
 0x69c   :  { %v2641_v54 = vpop.f32.mrf.mxu1 }
 0x69e   :  { %v2141_v55 = vpop.f32.mrf.mxu1 }
 0x6a0   :  { %v2643_v58 = vpop.f32.mrf.mxu1 }
 0x6a2   :  { %v2142_v59 = vpop.f32.mrf.mxu1 }
 0x6a4   :  { %v576_v61 = vpop.f32.mrf.mxu1 }
 0x6a5   :  { %v577_v62 = vadd.f32 %v576_v61, %v2609_v14 }
 0x6a6   :  { %v2153_v63 = vpop.f32.mrf.mxu1 }
 0x6a7   :  { %v583_v0 = vsel %vm69_vm5, %v577_v62, -inf }
 0x6a8   :  { %584 = vmax.xlane.f32.xlu0 %v583_v0  ;;  %v579_v2 = vpop.f32.mrf.mxu1 }
 0x6a9   :  { %v580_v3 = vadd.f32 %v579_v2, %v2613_v19 }
 0x6aa   :  { %v2154_v4 = vpop.f32.mrf.mxu1 }
 0x6ab   :  { %v586_v5 = vsel %vm69_vm5, %v580_v3, -inf }
 0x6ac   :  { %587 = vmax.xlane.f32.xlu0 %v586_v5  ;;  %v694_v6 = vpop.f32.mrf.mxu1 }
 0x6ad   :  { %v695_v8 = vadd.f32 %v694_v6, %v2609_v14 }
 0x6ae   :  { %v2165_v9 = vpop.f32.mrf.mxu1 }
 0x6af   :  { %v701_v10 = vsel %vm69_vm5, %v695_v8, -inf }
 0x6b0   :  { %702 = vmax.xlane.f32.xlu1 %v701_v10  ;;  %v697_v12 = vpop.f32.mrf.mxu1 }
 0x6b1   :  { %v698_v13 = vadd.f32 %v697_v12, %v2613_v19 }
 0x6b2   :  { %v2166_v15 = vpop.f32.mrf.mxu1 }
 0x6b3   :  { %v704_v16 = vsel %vm69_vm5, %v698_v13, -inf }
 0x6b4   :  { %705 = vmax.xlane.f32.xlu0 %v704_v16  ;;  %364 = vadd.xlane.f32.xlu1 %v363_v17 }
 0x6b8   :  { %367 = vadd.xlane.f32.xlu0 %v366_v20 }
 0x731   :  { %v585_v21 = vpop.xlane.xlu0 %584 }
 0x732   :  { %v589_v23 = vsub.f32 %v577_v62, %v585_v21 }
 0x734   :  { %v591_v24 = vmul.f32 1.442695, %v589_v23 }
 0x735   :  { %v588_v25 = vpop.xlane.xlu0 %587 }
 0x736   :  { %2369 = vpow2.f32 %v591_v24  ;;  %v590_v26 = vsub.f32 %v580_v3, %v588_v25 }
 0x738   :  { %v593_v28 = vmul.f32 1.442695, %v590_v26 }
 0x739   :  { %v703_v29 = vpop.xlane.xlu1 %702 }
 0x73a   :  { %2371 = vpow2.f32 %v593_v28  ;;  %v707_v30 = vsub.f32 %v695_v8, %v703_v29 }
 0x73c   :  { %v709_v31 = vmul.f32 1.442695, %v707_v30 }
 0x73d   :  { %v706_v32 = vpop.xlane.xlu0 %705  ;;  %v365_v33 = vpop.xlane.xlu1 %364 }
 0x73e   :  { %2373 = vpow2.f32 %v709_v31  ;;  %v708_v34 = vsub.f32 %v698_v13, %v706_v32 }
 0x73f   :  { %2375 = vrcp.f32 %v365_v33 }
 0x740   :  { %v711_v35 = vmul.f32 1.442695, %v708_v34 }
 0x741   :  { %v368_v36 = vpop.xlane.xlu0 %367 }
 0x742   :  { %2377 = vpow2.f32 %v711_v35 }
 0x743   :  { %v2370_v37 = vpop.eup %2369  ;;  %2379 = vrcp.f32 %v368_v36 }
 0x744   :  { %v595_v38 = vsel %vm69_vm5, %v2370_v37, 0.0 }
 0x745   :  { %596 = vadd.xlane.f32.xlu1 %v595_v38  ;;  %v2694_v38 = vld [vmem:[#allocation2 + $0x50] sm:$0xff]  }
 0x746   :  { %2174 = vmatpush3.bf16.msra.mxu1 %v2694_v38 }
 0x747   :  { %v2372_v39 = vpop.eup %2371  ;;  %2175 = vmatprep.subr.bf16.mxu1 %v2510_v1 }
 0x748   :  { %v598_v41 = vsel %vm69_vm5, %v2372_v39, 0.0 }
 0x749   :  { %599 = vadd.xlane.f32.xlu0 %v598_v41  ;;  %v1995_v41 = vld [vmem:[#allocation5 + $0xc0] ss:$0 sm:$0xff] }
 0x74b   :  { %v2374_v42 = vpop.eup %2373 }
 0x74c   :  { %v713_v43 = vsel %vm69_vm5, %v2374_v42, 0.0  ;;  %v2376_v44 = vpop.eup %2375 }
 0x74d   :  { %714 = vadd.xlane.f32.xlu1 %v713_v43  ;;  %v371_v48 = vmul.f32 %v2376_v44, %v2366_v11 }
 0x74f   :  { %v2378_v45 = vpop.eup %2377 }
 0x750   :  { %v2380_v46 = vpop.eup %2379  ;;  %v716_v47 = vsel %vm69_vm5, %v2378_v45, 0.0 }
 0x751   :  { %717 = vadd.xlane.f32.xlu0 %v716_v47  ;;  %v372_v49 = vmul.f32 %v2380_v46, %v2368_v18 }
 0x753   :  { %v374_v50 = vpack.c.bf16 %v372_v49, %v371_v48 }
 0x755   :  { %2146 = vmatmul.mubr.msk.bf16.vlgmr.msra.gmra.mxu0 %vm69_vm5, %v374_v50 }
 0x756   :  { %2157 = vmatprep.mubr.msk.bf16.mxu0 %vm2511_vm2, %v2510_v1 }
 0x75e   :  { %606 = vrot.lane.b32.xlu1 %v2602_v7, %s2504_s15 }
 0x767   :  { %724 = vrot.lane.b32.xlu0 %v2602_v7, %s2513_s2 }
 0x7ce   :  { %v597_v51 = vpop.xlane.xlu1 %596 }
 0x7cf   :  { %2381 = vrcp.f32 %v597_v51 }
 0x7d2   :  { %v600_v52 = vpop.xlane.xlu0 %599 }
 0x7d3   :  { %2383 = vrcp.f32 %v600_v52 }
 0x7d6   :  { %v715_v53 = vpop.xlane.xlu1 %714 }
 0x7d7   :  { %2385 = vrcp.f32 %v715_v53 }
 0x7da   :  { %v607_v55 = vpop.permute.xlu1 %606  ;;  %v718_v56 = vpop.xlane.xlu0 %717 }
 0x7db   :  { %2387 = vrcp.f32 %v718_v56  ;;  %2156 = vmatpush3.bf16.msra.mxu0 %v607_v55 }
 0x7dc   :  { %2167 = vmatprep.subr.bf16.mxu0 %v2510_v1  ;;  %v2382_v57 = vpop.eup %2381 }
 0x7dd   :  { %v603_v60 = vmul.f32 %v2382_v57, %v2370_v37 }
 0x7de   :  { %v725_v63 = vpop.permute.xlu0 %724 }
 0x7e0   :  { %v2384_v59 = vpop.eup %2383 }
 0x7e1   :  { %v604_v61 = vmul.f32 %v2384_v59, %v2372_v39  ;;  %v2698_v39 = vld [vmem:[#allocation2 + $0x48] sm:$0xff]  }
 0x7e2   :  { %2176 = vmatpush3.bf16.msra.mxu1 %v2698_v39 }
 0x7e3   :  { %v605_v62 = vpack.c.bf16 %v604_v61, %v603_v60  ;;  %2189 = vmatprep.subr.bf16.mxu1 %v2510_v1  ;;  %v2706_v60 = vld [vmem:[#allocation2 + $0x60] sm:$0xff]   ;;  %v2710_v61 = vld [vmem:[#allocation2 + $0x58] sm:$0xff]  }
 0x7e4   :  { %v2386_v7 = vpop.eup %2385 }
 0x7e5   :  { %2158 = vmatmul.mubr.msk.bf16.vlgmr.msra.gmra.mxu0 %vm69_vm5, %v605_v62  ;;  %v721_v2 = vmul.f32 %v2386_v7, %v2374_v42 }
 0x7e6   :  { %2168 = vmatpush3.bf16.msra.mxu0 %v725_v63  ;;  %2169 = vmatprep.mubr.msk.bf16.mxu0 %vm2511_vm2, %v2510_v1 }
 0x7e7   :  { %2181 = vmatprep.subr.bf16.mxu0 %v2510_v1 }
 0x7e8   :  { %v2388_v0 = vpop.eup %2387 }
 0x7e9   :  { %v722_v3 = vmul.f32 %v2388_v0, %v2378_v45 }
 0x7eb   :  { %v723_v4 = vpack.c.bf16 %v722_v3, %v721_v2 }
 0x7ed   :  { %2170 = vmatmul.mubr.msk.bf16.vlgmr.msra.gmra.mxu0 %vm69_vm5, %v723_v4 }
 0x7ee   :  { %2185 = vmatprep.mubr.msk.bf16.mxu0 %vm2511_vm2, %v2510_v1  ;;  %2182 = vmatpush3.bf16.msra.mxu0 %v2706_v60 }
 0x7ef   :  { %2183 = vmatprep.subr.bf16.mxu0 %v2510_v1 }
 0x7f2   :  { %2184 = vmatpush3.bf16.msra.mxu0 %v2710_v61 }
 0x7f3   :  { %2197 = vmatprep.subr.bf16.mxu0 %v2510_v1 }
 0x815   :  { %v530_v5 = vpop.f32.mrf.mxu0 }
 0x816   :  { %v531_v13 = vadd.f32 %v530_v5, %v2641_v54 }
 0x817   :  { %v2147_v6 = vpop.f32.mrf.mxu0 }
 0x819   :  { %v533_v8 = vpop.f32.mrf.mxu0 }
 0x81a   :  { %v534_v18 = vadd.f32 %v533_v8, %v2643_v58 }
 0x81b   :  { %v2148_v9 = vpop.f32.mrf.mxu0 }
 0x8a5   :  { %v646_v10 = vpop.f32.mrf.mxu0 }
 0x8a6   :  { %v653_v16 = vadd.f32 %v646_v10, %v531_v13 }
 0x8a7   :  { %v2159_v11 = vpop.f32.mrf.mxu0 }
 0x8a9   :  { %v649_v12 = vpop.f32.mrf.mxu0 }
 0x8aa   :  { %v654_v23 = vadd.f32 %v649_v12, %v534_v18 }
 0x8ab   :  { %v2160_v15 = vpop.f32.mrf.mxu0 }
 0x8ad   :  { %v764_v17 = vpop.f32.mrf.mxu0 }
 0x8ae   :  { %v771_v20 = vadd.f32 %v764_v17, %v653_v16 }
 0x8af   :  { %v2171_v21 = vpop.f32.mrf.mxu0 }
 0x8b0   :  { %v2677_v24 = vadd.f32 %v771_v20, %v2563_v22 }
 0x8b1   :  { %v767_v25 = vpop.f32.mrf.mxu0 }
 0x8b2   :  { %v772_v26 = vadd.f32 %v767_v25, %v654_v23  ;;  %v775_v28 = vsel %vm148_vm6, %v2677_v24, 0.0 }
 0x8b3   :  { %776 = vadd.xlane.f32.xlu1 %v775_v28  ;;  %v2172_v29 = vpop.f32.mrf.mxu0 }
 0x8b4   :  { %v2682_v54 = vadd.f32 %v772_v26, %v2567_v27 }
 0x8b6   :  { %v778_v30 = vsel %vm148_vm6, %v2682_v54, 0.0 }
 0x8b7   :  { %779 = vadd.xlane.f32.xlu0 %v778_v30 }
 0x93c   :  { %v777_v58 = vpop.xlane.xlu1 %776 }
 0x93d   :  { %v781_v31 = vmul.f32 0.03125, %v777_v58 }
 0x93f   :  { %v783_v32 = vsub.f32 %v2677_v24, %v781_v31  ;;  %v2731_v31 = vld [vmem:[#allocation5 + $0xb9] ss:$0 sm:$0xff] }
 0x940   :  { %v780_v22 = vpop.xlane.xlu0 %779 }
 0x941   :  { %v782_v33 = vmul.f32 0.03125, %v780_v22  ;;  %v785_v34 = vmul.f32 %v783_v32, %v783_v32  ;;  %v2348_v22 = vld [vmem:[#allocation2 + $0x40] sm:$0xff]  }
 0x943   :  { %v784_v35 = vsub.f32 %v2682_v54, %v782_v33  ;;  %v787_v36 = vsel %vm148_vm6, %v785_v34, 0.0  ;;  %v2349_v33 = vld [vmem:[#allocation2 + $0x18] sm:$0xff]  }
 0x944   :  { %788 = vadd.xlane.f32.xlu1 %v787_v36  ;;  %v2350_v34 = vld [vmem:[#allocation2 + $0x38] sm:$0xff]  }
 0x945   :  { %v786_v37 = vmul.f32 %v784_v35, %v784_v35 }
 0x947   :  { %v790_v27 = vsel %vm148_vm6, %v786_v37, 0.0 }
 0x948   :  { %791 = vadd.xlane.f32.xlu0 %v790_v27 }
 0x955   :  { %801 = vrot.lane.b32.xlu1 %v2575_v40, %s2504_s15 }
 0x959   :  { %934 = vrot.lane.b32.xlu1 %v1995_v41, %s2512_s0 }
 0x95e   :  { %806 = vrot.lane.b32.xlu0 %v2575_v40, %s2513_s2 }
 0x9cd   :  { %v789_v42 = vpop.xlane.xlu1 %788 }
 0x9ce   :  { %v793_v43 = vmul.f32 0.03125, %v789_v42 }
 0x9d0   :  { %v795_v44 = vadd.f32 1e-05, %v793_v43 }
 0x9d1   :  { %v792_v45 = vpop.xlane.xlu0 %791  ;;  %v802_v49 = vpop.permute.xlu1 %801 }
 0x9d2   :  { %2389 = vrsqrt.f32 %v795_v44  ;;  %v794_v40 = vmul.f32 0.03125, %v792_v45 }
 0x9d4   :  { %v796_v46 = vadd.f32 1e-05, %v794_v40 }
 0x9d5   :  { %v807_v53 = vpop.permute.xlu0 %806  ;;  %v935_v8 = vpop.permute.xlu1 %934 }
 0x9d6   :  { %2391 = vrsqrt.f32 %v796_v46 }
 0x9df   :  { %v2390_v47 = vpop.eup %2389 }
 0x9e0   :  { %v799_v48 = vmul.f32 %v2390_v47, %v783_v32  ;;  %v2347_v32 = vld [vmem:[#allocation2 + $0x20] sm:$0xff]  }
 0x9e2   :  { %v804_v52 = vmul.f32 %v802_v49, %v799_v48 }
 0x9e3   :  { %v2392_v50 = vpop.eup %2391 }
 0x9e4   :  { %v800_v51 = vmul.f32 %v2392_v50, %v784_v35  ;;  %v809_v56 = vadd.f32 %v807_v53, %v804_v52 }
 0x9e6   :  { %v805_v55 = vmul.f32 %v802_v49, %v800_v51 }
 0x9e8   :  { %v810_v57 = vadd.f32 %v807_v53, %v805_v55 }
 0x9ea   :  { %v811_v59 = vpack.c.bf16 %v810_v57, %v809_v56 }
 0x9ec   :  { %2178 = vmatmul.mubr.msk.bf16.vlgmr.msra.gmra.mxu1 %vm148_vm6, %v811_v59 }
 0x9ed   :  { %2193 = vmatprep.mubr.msk.bf16.mxu1 %vm2511_vm2, %v2510_v1  ;;  %2190 = vmatpush3.bf16.msra.mxu1 %v2347_v32 }
 0x9ee   :  { %2191 = vmatprep.subr.bf16.mxu1 %v2510_v1 }
 0x9f1   :  { %2192 = vmatpush3.bf16.msra.mxu1 %v2349_v33 }
 0x9f2   :  { %2205 = vmatprep.subr.bf16.mxu1 %v2510_v1 }
 0xaac   :  { %v861_v62 = vpop.f32.mrf.mxu1 }
 0xaad   :  { %v872_v7 = vadd.f32 %v1995_v41, %v861_v62 }
 0xaae   :  { %v2179_v63 = vpop.f32.mrf.mxu1 }
 0xaaf   :  { %v874_v4 = vmax.f32 %v872_v7, 0.0 }
 0xab0   :  { %v864_v0 = vpop.f32.mrf.mxu1 }
 0xab1   :  { %v873_v2 = vadd.f32 %v1995_v41, %v864_v0 }
 0xab2   :  { %v2180_v3 = vpop.f32.mrf.mxu1 }
 0xab3   :  { %v875_v5 = vmax.f32 %v873_v2, 0.0 }
 0xab5   :  { %v876_v6 = vpack.c.bf16 %v875_v5, %v874_v4 }
 0xab7   :  { %2186 = vmatmul.mubr.msk.bf16.vlgmr.msra.gmra.mxu0 %vm148_vm6, %v876_v6 }
 0xab8   :  { %2201 = vmatprep.mubr.msk.bf16.mxu0 %vm2511_vm2, %v2510_v1  ;;  %2198 = vmatpush3.bf16.msra.mxu0 %v2348_v22 }
 0xab9   :  { %2199 = vmatprep.subr.bf16.mxu0 %v2510_v1 }
 0xabc   :  { %2200 = vmatpush3.bf16.msra.mxu0 %v2350_v34 }
 0xabd   :  { %2211 = vmatprep.subr.bf16.mxu0 %v2510_v1 }
 0xb77   :  { %v926_v9 = vpop.f32.mrf.mxu0 }
 0xb78   :  { %v937_v10 = vadd.f32 %v935_v8, %v926_v9 }
 0xb79   :  { %v2187_v11 = vpop.f32.mrf.mxu0 }
 0xb7a   :  { %v2718_v12 = vadd.f32 %v937_v10, %v2677_v24 }
 0xb7b   :  { %v929_v13 = vpop.f32.mrf.mxu0 }
 0xb7c   :  { %v938_v15 = vadd.f32 %v935_v8, %v929_v13  ;;  %v943_v16 = vsel %vm148_vm6, %v2718_v12, 0.0 }
 0xb7d   :  { %944 = vadd.xlane.f32.xlu1 %v943_v16  ;;  %v2188_v17 = vpop.f32.mrf.mxu0 }
 0xb7e   :  { %v2723_v18 = vadd.f32 %v938_v15, %v2682_v54 }
 0xb80   :  { %v946_v20 = vsel %vm148_vm6, %v2723_v18, 0.0 }
 0xb81   :  { %947 = vadd.xlane.f32.xlu0 %v946_v20 }
 0xc06   :  { %v945_v21 = vpop.xlane.xlu1 %944 }
 0xc07   :  { %v949_v23 = vmul.f32 0.03125, %v945_v21 }
 0xc09   :  { %v951_v25 = vsub.f32 %v2718_v12, %v949_v23 }
 0xc0a   :  { %v948_v24 = vpop.xlane.xlu0 %947 }
 0xc0b   :  { %v950_v26 = vmul.f32 0.03125, %v948_v24  ;;  %v953_v28 = vmul.f32 %v951_v25, %v951_v25 }
 0xc0d   :  { %v952_v29 = vsub.f32 %v2723_v18, %v950_v26  ;;  %v955_v30 = vsel %vm148_vm6, %v953_v28, 0.0 }
 0xc0e   :  { %956 = vadd.xlane.f32.xlu0 %v955_v30 }
 0xc0f   :  { %v954_v58 = vmul.f32 %v952_v29, %v952_v29 }
 0xc11   :  { %v958_v54 = vsel %vm148_vm6, %v954_v58, 0.0 }
 0xc12   :  { %959 = vadd.xlane.f32.xlu1 %v958_v54 }
 0xc24   :  { %976 = vrot.lane.b32.xlu0 %v2731_v31, %s2512_s0 }
 0xc97   :  { %v957_v35 = vpop.xlane.xlu0 %956 }
 0xc98   :  { %v961_v36 = vmul.f32 0.03125, %v957_v35 }
 0xc9a   :  { %v963_v37 = vadd.f32 1e-05, %v961_v36 }
 0xc9b   :  { %v960_v27 = vpop.xlane.xlu1 %959  ;;  %v977_v47 = vpop.permute.xlu0 %976 }
 0xc9c   :  { %2393 = vrsqrt.f32 %v963_v37  ;;  %v962_v41 = vmul.f32 0.03125, %v960_v27 }
 0xc9e   :  { %v964_v42 = vadd.f32 1e-05, %v962_v41 }
 0xca0   :  { %2395 = vrsqrt.f32 %v964_v42 }
 0xca9   :  { %v2394_v43 = vpop.eup %2393 }
 0xcaa   :  { %v967_v44 = vmul.f32 %v2394_v43, %v951_v25 }
 0xcac   :  { %v973_v46 = vmul.f32 %v2731_v31, %v967_v44 }
 0xcad   :  { %v2396_v45 = vpop.eup %2395 }
 0xcae   :  { %v968_v40 = vmul.f32 %v2396_v45, %v952_v29  ;;  %v979_v49 = vadd.f32 %v977_v47, %v973_v46 }
 0xcb0   :  { %v974_v48 = vmul.f32 %v2731_v31, %v968_v40 }
 0xcb2   :  { %v980_v50 = vadd.f32 %v977_v47, %v974_v48 }
 0xcb4   :  { %v981_v51 = vpack.c.bf16 %v980_v50, %v979_v49 }
 0xcb6   :  { %2194 = vmatmul.mubr.msk.bf16.vlgmr.msra.gmra.mxu1 %vm148_vm6, %v981_v51  ;;  %2202 = vmatmul.mubr.msk.bf16.vlgmr.msra.gmra.mxu0 %vm148_vm6, %v981_v51  ;;  %v2744_v52 = vsel %vm148_vm6, %v981_v51, 0 }
 0xcb7   :  { %2206 = vmatpush3.bf16.xpose.msra.mxu1 %v2744_v52  ;;  %2212 = vmatpush3.bf16.xpose.msra.mxu0 %v2744_v52 }
 0xcb8   :  { %2207 = vmatprep.mubr.msk.bf16.mxu1 %vm2511_vm2, %v2510_v1  ;;  %2213 = vmatprep.mubr.msk.bf16.mxu0 %vm2511_vm2, %v2510_v1 }
 0xcb9   :  { %2223 = vmatprep.subr.bf16.mxu0 %v2510_v1  ;;  %2217 = vmatprep.subr.bf16.mxu1 %v2510_v1 }
 0xd76   :  { %v1039_v53 = vpop.f32.mrf.mxu1  ;;  %v1092_v55 = vpop.f32.mrf.mxu0 }
 0xd78   :  { %v2195_v56 = vpop.f32.mrf.mxu1  ;;  %v2203_v57 = vpop.f32.mrf.mxu0 }
 0xd7a   :  { %v1042_v59 = vpop.f32.mrf.mxu1  ;;  %v1095_v62 = vpop.f32.mrf.mxu0 }
 0xd7b   :  { %v1099_v63 = vpack.c.bf16 %v1042_v59, %v1039_v53  ;;  %v2754_v7 = vpack.c.bf16 %v1095_v62, %v1092_v55 }
 0xd7c   :  { %v2196_v0 = vpop.f32.mrf.mxu1  ;;  %v2204_v2 = vpop.f32.mrf.mxu0 }
 0xd7d   :  { %1169 = vrot.lane.b32.xlu1 %v1099_v63, %s2512_s0  ;;  %2208 = vmatmul.mubr.msk.bf16.vlgmr.msra.gmra.mxu1 %vm148_vm6, %v1099_v63 }
 0xd7e   :  { %2219 = vmatprep.mubr.msk.bf16.mxu1 %vm2511_vm2, %v2510_v1 }
 0xdef   :  { %v1170_v3 = vpop.permute.xlu1 %1169 }
 0xdf0   :  { %2214 = vmatmul.mubr.msk.bf16.vlgmr.msra.gmra.mxu0 %vm148_vm6, %v1170_v3 }
 0xdf1   :  { %2224 = vmatpush3.bf16.msra.mxu0 %v2754_v7  ;;  %2225 = vmatprep.mubr.msk.bf16.mxu0 %vm2511_vm2, %v2510_v1 }
 0xdf2   :  { %2235 = vmatprep.subr.bf16.mxu0 %v2510_v1 }
 0xe3d   :  { %v1137_v4 = vpop.f32.mrf.mxu1 }
 0xe3e   :  { %v1138_v32 = vadd.f32 %v1137_v4, %v2609_v14 }
 0xe3f   :  { %v2209_v5 = vpop.f32.mrf.mxu1 }
 0xe40   :  { %v1144_v22 = vsel %vm69_vm5, %v1138_v32, -inf }
 0xe41   :  { %v1140_v6 = vpop.f32.mrf.mxu1 }
 0xe42   :  { %v1141_v33 = vadd.f32 %v1140_v6, %v2613_v19 }
 0xe43   :  { %v2210_v8 = vpop.f32.mrf.mxu1 }
 0xe44   :  { %v1147_v34 = vsel %vm69_vm5, %v1141_v33, -inf }
 0xeb0   :  { %v1208_v9 = vpop.f32.mrf.mxu0 }
 0xeb1   :  { %v1209_v10 = vadd.f32 %v1208_v9, %v2609_v14 }
 0xeb2   :  { %v2215_v11 = vpop.f32.mrf.mxu0 }
 0xeb3   :  { %v1215_v13 = vsel %vm69_vm5, %v1209_v10, -inf }
 0xeb4   :  { %1216 = vmax.xlane.f32.xlu1 %v1215_v13  ;;  %v1211_v15 = vpop.f32.mrf.mxu0 }
 0xeb5   :  { %v1212_v16 = vadd.f32 %v1211_v15, %v2613_v19 }
 0xeb6   :  { %v2216_v17 = vpop.f32.mrf.mxu0 }
 0xeb7   :  { %v1218_v20 = vsel %vm69_vm5, %v1212_v16, -inf }
 0xeb8   :  { %1219 = vmax.xlane.f32.xlu0 %v1218_v20 }
 0xf3d   :  { %v1217_v21 = vpop.xlane.xlu1 %1216 }
 0xf3e   :  { %v1221_v23 = vsub.f32 %v1209_v10, %v1217_v21 }
 0xf40   :  { %v1223_v25 = vmul.f32 1.442695, %v1221_v23 }
 0xf41   :  { %v1220_v24 = vpop.xlane.xlu0 %1219 }
 0xf42   :  { %2397 = vpow2.f32 %v1223_v25  ;;  %v1222_v26 = vsub.f32 %v1212_v16, %v1220_v24 }
 0xf44   :  { %v1225_v28 = vmul.f32 1.442695, %v1222_v26 }
 0xf46   :  { %2399 = vpow2.f32 %v1225_v28 }
 0xf4f   :  { %v2398_v29 = vpop.eup %2397 }
 0xf50   :  { %v1227_v30 = vsel %vm69_vm5, %v2398_v29, 0.0 }
 0xf51   :  { %1228 = vadd.xlane.f32.xlu0 %v1227_v30 }
 0xf53   :  { %v2400_v58 = vpop.eup %2399 }
 0xf54   :  { %v1230_v54 = vsel %vm69_vm5, %v2400_v58, 0.0 }
 0xf55   :  { %1231 = vadd.xlane.f32.xlu1 %v1230_v54 }
 0xf66   :  { %1330 = vrot.lane.b32.xlu1 %v1099_v63, %s2504_s15 }
 0xf67   :  { %1239 = vrot.lane.b32.xlu0 %v2754_v7, %s2512_s0 }
 0xf6a   :  { %1448 = vrot.lane.b32.xlu1 %v1099_v63, %s2513_s2 }
 0xf86   :  { %1145 = vmax.xlane.f32.xlu0 %v1144_v22 }
 0xf8e   :  { %1148 = vmax.xlane.f32.xlu1 %v1147_v34 }
 0xfda   :  { %v1229_v35 = vpop.xlane.xlu0 %1228 }
 0xfdb   :  { %2401 = vrcp.f32 %v1229_v35 }
 0xfde   :  { %v1232_v36 = vpop.xlane.xlu1 %1231  ;;  %v1240_v37 = vpop.permute.xlu0 %1239 }
 0xfdf   :  { %2403 = vrcp.f32 %v1232_v36  ;;  %2218 = vmatpush3.bf16.msra.mxu1 %v1240_v37 }
 0xfe0   :  { %2229 = vmatprep.subr.bf16.mxu1 %v2510_v1 }
 0xfe2   :  { %v1331_v45 = vpop.permute.xlu1 %1330 }
 0xfe6   :  { %v1449_v40 = vpop.permute.xlu1 %1448 }
 0xfe8   :  { %v2402_v27 = vpop.eup %2401 }
 0xfe9   :  { %v1235_v42 = vmul.f32 %v2402_v27, %v2398_v29 }
 0xfec   :  { %v2404_v41 = vpop.eup %2403 }
 0xfed   :  { %v1236_v43 = vmul.f32 %v2404_v41, %v2400_v58 }
 0xfef   :  { %v1237_v44 = vpack.c.bf16 %v1236_v43, %v1235_v42 }
 0xff1   :  { %2220 = vmatmul.mubr.msk.bf16.vlgmr.msra.gmra.mxu1 %vm69_vm5, %v1237_v44 }
 0xff2   :  { %2230 = vmatpush3.bf16.xpose.msra.mxu1 %v2744_v52  ;;  %2231 = vmatprep.mubr.msk.bf16.mxu1 %vm2511_vm2, %v2510_v1 }
 0xff3   :  { %2241 = vmatprep.subr.bf16.mxu1 %v2510_v1 }
 0xff9   :  { %2232 = vmatmul.mubr.msk.bf16.vlgmr.msra.gmra.mxu1 %vm148_vm6, %v1331_v45 }
 0xffa   :  { %2242 = vmatpush3.bf16.xpose.msra.mxu1 %v2744_v52  ;;  %2243 = vmatprep.mubr.msk.bf16.mxu1 %vm2511_vm2, %v2510_v1 }
 0xffb   :  { %2253 = vmatprep.subr.bf16.mxu1 %v2510_v1 }
0x1001   :  { %2244 = vmatmul.mubr.msk.bf16.vlgmr.msra.gmra.mxu1 %vm148_vm6, %v1449_v40 }
0x1002   :  { %2254 = vmatpush3.bf16.msra.mxu1 %v2694_v38  ;;  %2257 = vmatprep.mubr.msk.bf16.mxu1 %vm2511_vm2, %v2510_v1 }
0x1003   :  { %2255 = vmatprep.subr.bf16.mxu1 %v2510_v1 }
0x1006   :  { %2256 = vmatpush3.bf16.msra.mxu1 %v2698_v39 }
0x1007   :  { %2269 = vmatprep.subr.bf16.mxu1 %v2510_v1 }
0x100f   :  { %v1146_v46 = vpop.xlane.xlu0 %1145 }
0x1010   :  { %v1150_v47 = vsub.f32 %v1138_v32, %v1146_v46 }
0x1012   :  { %v1152_v51 = vmul.f32 1.442695, %v1150_v47 }
0x1014   :  { %2405 = vpow2.f32 %v1152_v51 }
0x1017   :  { %v1149_v48 = vpop.xlane.xlu1 %1148 }
0x1018   :  { %v1151_v52 = vsub.f32 %v1141_v33, %v1149_v48 }
0x101a   :  { %v1154_v55 = vmul.f32 1.442695, %v1151_v52 }
0x101c   :  { %2407 = vpow2.f32 %v1154_v55 }
0x1021   :  { %v2406_v8 = vpop.eup %2405 }
0x1022   :  { %v1156_v15 = vsel %vm69_vm5, %v2406_v8, 0.0 }
0x1029   :  { %v2408_v16 = vpop.eup %2407 }
0x102a   :  { %v1159_v17 = vsel %vm69_vm5, %v2408_v16, 0.0 }
0x10b1   :  { %v2797_v49 = vpop.f32.mrf.mxu1 }
0x10b3   :  { %v2221_v50 = vpop.f32.mrf.mxu1 }
0x10b5   :  { %v2799_v53 = vpop.f32.mrf.mxu1 }
0x10b7   :  { %v2222_v38 = vpop.f32.mrf.mxu1 }
0x10b9   :  { %v1369_v56 = vpop.f32.mrf.mxu1 }
0x10ba   :  { %v1370_v57 = vadd.f32 %v1369_v56, %v2609_v14 }
0x10bb   :  { %v2233_v59 = vpop.f32.mrf.mxu1 }
0x10bc   :  { %v1376_v39 = vsel %vm69_vm5, %v1370_v57, -inf }
0x10bd   :  { %1377 = vmax.xlane.f32.xlu0 %v1376_v39  ;;  %v1372_v62 = vpop.f32.mrf.mxu1 }
0x10be   :  { %v1373_v63 = vadd.f32 %v1372_v62, %v2613_v19 }
0x10bf   :  { %v2234_v0 = vpop.f32.mrf.mxu1 }
0x10c0   :  { %v1379_v2 = vsel %vm69_vm5, %v1373_v63, -inf }
0x10c1   :  { %1380 = vmax.xlane.f32.xlu0 %v1379_v2  ;;  %v1487_v3 = vpop.f32.mrf.mxu1 }
0x10c2   :  { %v1488_v4 = vadd.f32 %v1487_v3, %v2609_v14 }
0x10c3   :  { %v2245_v5 = vpop.f32.mrf.mxu1 }
0x10c4   :  { %v1494_v6 = vsel %vm69_vm5, %v1488_v4, -inf }
0x10c5   :  { %1495 = vmax.xlane.f32.xlu1 %v1494_v6  ;;  %v1490_v9 = vpop.f32.mrf.mxu1 }
0x10c6   :  { %v1491_v10 = vadd.f32 %v1490_v9, %v2613_v19 }
0x10c7   :  { %v2246_v11 = vpop.f32.mrf.mxu1 }
0x10c8   :  { %v1497_v13 = vsel %vm69_vm5, %v1491_v10, -inf }
0x10c9   :  { %1498 = vmax.xlane.f32.xlu0 %v1497_v13  ;;  %1157 = vadd.xlane.f32.xlu1 %v1156_v15 }
0x10cd   :  { %1160 = vadd.xlane.f32.xlu0 %v1159_v17 }
0x1146   :  { %v1378_v14 = vpop.xlane.xlu0 %1377 }
0x1147   :  { %v1382_v20 = vsub.f32 %v1370_v57, %v1378_v14 }
0x1149   :  { %v1384_v21 = vmul.f32 1.442695, %v1382_v20 }
0x114a   :  { %v1381_v23 = vpop.xlane.xlu0 %1380 }
0x114b   :  { %2409 = vpow2.f32 %v1384_v21  ;;  %v1383_v25 = vsub.f32 %v1373_v63, %v1381_v23 }
0x114d   :  { %v1386_v24 = vmul.f32 1.442695, %v1383_v25 }
0x114e   :  { %v1496_v26 = vpop.xlane.xlu1 %1495 }
0x114f   :  { %2411 = vpow2.f32 %v1386_v24  ;;  %v1500_v19 = vsub.f32 %v1488_v4, %v1496_v26 }
0x1151   :  { %v1502_v28 = vmul.f32 1.442695, %v1500_v19 }
0x1152   :  { %v1499_v29 = vpop.xlane.xlu0 %1498  ;;  %v1158_v30 = vpop.xlane.xlu1 %1157 }
0x1153   :  { %2413 = vpow2.f32 %v1502_v28  ;;  %v1501_v58 = vsub.f32 %v1491_v10, %v1499_v29 }
0x1154   :  { %2415 = vrcp.f32 %v1158_v30 }
0x1155   :  { %v1504_v54 = vmul.f32 1.442695, %v1501_v58 }
0x1156   :  { %v1161_v32 = vpop.xlane.xlu0 %1160 }
0x1157   :  { %2417 = vpow2.f32 %v1504_v54 }
0x1158   :  { %v2410_v22 = vpop.eup %2409  ;;  %2419 = vrcp.f32 %v1161_v32  ;;  %v2015_v32 = vld [vmem:[#allocation5 + $0xc1] ss:$0 sm:$0xff] }
0x1159   :  { %v1388_v33 = vsel %vm69_vm5, %v2410_v22, 0.0 }
0x115a   :  { %1389 = vadd.xlane.f32.xlu1 %v1388_v33 }
0x115c   :  { %v2412_v34 = vpop.eup %2411 }
0x115d   :  { %v1391_v35 = vsel %vm69_vm5, %v2412_v34, 0.0 }
0x115e   :  { %1392 = vadd.xlane.f32.xlu0 %v1391_v35 }
0x1160   :  { %v2414_v36 = vpop.eup %2413 }
0x1161   :  { %v1506_v37 = vsel %vm69_vm5, %v2414_v36, 0.0  ;;  %v2416_v27 = vpop.eup %2415 }
0x1162   :  { %1507 = vadd.xlane.f32.xlu1 %v1506_v37  ;;  %v1164_v44 = vmul.f32 %v2416_v27, %v2406_v8 }
0x1164   :  { %v2418_v41 = vpop.eup %2417 }
0x1165   :  { %v2420_v42 = vpop.eup %2419  ;;  %v1509_v43 = vsel %vm69_vm5, %v2418_v41, 0.0 }
0x1166   :  { %1510 = vadd.xlane.f32.xlu0 %v1509_v43  ;;  %v1165_v45 = vmul.f32 %v2420_v42, %v2408_v16 }
0x1168   :  { %v1167_v40 = vpack.c.bf16 %v1165_v45, %v1164_v44 }
0x116a   :  { %2226 = vmatmul.mubr.msk.bf16.vlgmr.msra.gmra.mxu0 %vm69_vm5, %v1167_v40 }
0x116b   :  { %2237 = vmatprep.mubr.msk.bf16.mxu0 %vm2511_vm2, %v2510_v1 }
0x1173   :  { %1399 = vrot.lane.b32.xlu1 %v2754_v7, %s2504_s15 }
0x117c   :  { %1517 = vrot.lane.b32.xlu0 %v2754_v7, %s2513_s2 }
0x11e3   :  { %v1390_v46 = vpop.xlane.xlu1 %1389 }
0x11e4   :  { %2421 = vrcp.f32 %v1390_v46 }
0x11e7   :  { %v1393_v47 = vpop.xlane.xlu0 %1392 }
0x11e8   :  { %2423 = vrcp.f32 %v1393_v47 }
0x11eb   :  { %v1508_v48 = vpop.xlane.xlu1 %1507 }
0x11ec   :  { %2425 = vrcp.f32 %v1508_v48 }
0x11ef   :  { %v1400_v50 = vpop.permute.xlu1 %1399  ;;  %v1511_v51 = vpop.xlane.xlu0 %1510 }
0x11f0   :  { %2427 = vrcp.f32 %v1511_v51  ;;  %2236 = vmatpush3.bf16.msra.mxu0 %v1400_v50 }
0x11f1   :  { %2247 = vmatprep.subr.bf16.mxu0 %v2510_v1  ;;  %v2422_v52 = vpop.eup %2421 }
0x11f2   :  { %v1396_v55 = vmul.f32 %v2422_v52, %v2410_v22 }
0x11f3   :  { %v1518_v59 = vpop.permute.xlu0 %1517 }
0x11f5   :  { %v2424_v38 = vpop.eup %2423 }
0x11f6   :  { %v1397_v56 = vmul.f32 %v2424_v38, %v2412_v34 }
0x11f8   :  { %v1398_v57 = vpack.c.bf16 %v1397_v56, %v1396_v55 }
0x11f9   :  { %v2426_v7 = vpop.eup %2425 }
0x11fa   :  { %2238 = vmatmul.mubr.msk.bf16.vlgmr.msra.gmra.mxu0 %vm69_vm5, %v1398_v57  ;;  %v1514_v62 = vmul.f32 %v2426_v7, %v2414_v36 }
0x11fb   :  { %2248 = vmatpush3.bf16.msra.mxu0 %v1518_v59  ;;  %2249 = vmatprep.mubr.msk.bf16.mxu0 %vm2511_vm2, %v2510_v1 }
0x11fc   :  { %2261 = vmatprep.subr.bf16.mxu0 %v2510_v1 }
0x11fd   :  { %v2428_v39 = vpop.eup %2427 }
0x11fe   :  { %v1515_v63 = vmul.f32 %v2428_v39, %v2418_v41 }
0x1200   :  { %v1516_v0 = vpack.c.bf16 %v1515_v63, %v1514_v62  ;;  %v2351_v63 = vld [vmem:[#allocation2 + $0x70] sm:$0xff]  }
0x1202   :  { %2250 = vmatmul.mubr.msk.bf16.vlgmr.msra.gmra.mxu0 %vm69_vm5, %v1516_v0  ;;  %v2352_v0 = vld [vmem:[#allocation2 + $0x68] sm:$0xff]  }
0x1203   :  { %2262 = vmatpush3.bf16.msra.mxu0 %v2706_v60  ;;  %2265 = vmatprep.mubr.msk.bf16.mxu0 %vm2511_vm2, %v2510_v1 }
0x1204   :  { %2263 = vmatprep.subr.bf16.mxu0 %v2510_v1 }
0x1207   :  { %2264 = vmatpush3.bf16.msra.mxu0 %v2710_v61 }
0x1208   :  { %2277 = vmatprep.subr.mxu0 %v2510_v1 }
0x122a   :  { %v1323_v2 = vpop.f32.mrf.mxu0 }
0x122b   :  { %v1324_v10 = vadd.f32 %v1323_v2, %v2797_v49 }
0x122c   :  { %v2227_v3 = vpop.f32.mrf.mxu0 }
0x122e   :  { %v1326_v4 = vpop.f32.mrf.mxu0 }
0x122f   :  { %v1327_v15 = vadd.f32 %v1326_v4, %v2799_v53 }
0x1230   :  { %v2228_v5 = vpop.f32.mrf.mxu0 }
0x12ba   :  { %v1439_v6 = vpop.f32.mrf.mxu0 }
0x12bb   :  { %v1446_v60 = vadd.f32 %v1439_v6, %v1324_v10 }
0x12bc   :  { %v2239_v8 = vpop.f32.mrf.mxu0 }
0x12be   :  { %v1442_v9 = vpop.f32.mrf.mxu0 }
0x12bf   :  { %v1447_v14 = vadd.f32 %v1442_v9, %v1327_v15 }
0x12c0   :  { %v2240_v11 = vpop.f32.mrf.mxu0 }
0x12c2   :  { %v1557_v13 = vpop.f32.mrf.mxu0 }
0x12c3   :  { %v1564_v16 = vadd.f32 %v1557_v13, %v1446_v60 }
0x12c4   :  { %v2251_v17 = vpop.f32.mrf.mxu0 }
0x12c5   :  { %v2837_v61 = vadd.f32 %v1564_v16, %v2718_v12  ;;  %v1877_v17 = vld [vmem:[#allocation5 + $0xa8] sm:$0xff] }
0x12c6   :  { %v1560_v20 = vpop.f32.mrf.mxu0 }
0x12c7   :  { %v1565_v21 = vadd.f32 %v1560_v20, %v1447_v14  ;;  %v1568_v23 = vsel %vm148_vm6, %v2837_v61, 0.0  ;;  %v1876_v14 = vld [vmem:[#allocation5 + $0xa0] sm:$0xff]  ;;  %v1875_v20 = vld [vmem:[#allocation5 + $0x98] sm:$0xff] }
0x12c8   :  { %1569 = vadd.xlane.f32.xlu1 %v1568_v23  ;;  %v2252_v25 = vpop.f32.mrf.mxu0  ;;  %v1872_v23 = vld [vmem:[#allocation5 + $0x80] sm:$0xff] }
0x12c9   :  { %v2842_v49 = vadd.f32 %v1565_v21, %v2723_v18  ;;  %v1873_v21 = vld [vmem:[#allocation5 + $0x88] sm:$0xff]  ;;  %v1871_v25 = vld [vmem:[#allocation5 + $0x78] sm:$0xff] }
0x12cb   :  { %v1571_v24 = vsel %vm148_vm6, %v2842_v49, 0.0 }
0x12cc   :  { %1572 = vadd.xlane.f32.xlu0 %v1571_v24  ;;  %v1869_v24 = vld [vmem:[#allocation5 + $0x68] sm:$0xff] }
0x1351   :  { %v1570_v53 = vpop.xlane.xlu1 %1569 }
0x1352   :  { %v1574_v26 = vmul.f32 0.03125, %v1570_v53  ;;  %v1868_v53 = vld [vmem:[#allocation5 + $0x60] sm:$0xff] }
0x1354   :  { %v1576_v19 = vsub.f32 %v2837_v61, %v1574_v26  ;;  %v1867_v26 = vld [vmem:[#allocation5 + $0x58] sm:$0xff] }
0x1355   :  { %v1573_v12 = vpop.xlane.xlu0 %1572 }
0x1356   :  { %v1575_v28 = vmul.f32 0.03125, %v1573_v12  ;;  %v1578_v29 = vmul.f32 %v1576_v19, %v1576_v19  ;;  %v1865_v12 = vld [vmem:[#allocation5 + $0x48] sm:$0xff] }
0x1358   :  { %v1577_v30 = vsub.f32 %v2842_v49, %v1575_v28  ;;  %v1580_v58 = vsel %vm148_vm6, %v1578_v29, 0.0  ;;  %v1864_v28 = vld [vmem:[#allocation5 + $0x40] sm:$0xff]  ;;  %v1863_v29 = vld [vmem:[#allocation5 + $0x38] sm:$0xff] }
0x1359   :  { %1581 = vadd.xlane.f32.xlu1 %v1580_v58 }
0x135a   :  { %v1579_v54 = vmul.f32 %v1577_v30, %v1577_v30 }
0x135c   :  { %v1583_v18 = vsel %vm148_vm6, %v1579_v54, 0.0  ;;  %v1785_v54 = vld [vmem:[#allocation5 + $0x28] sm:$0xff] }
0x135d   :  { %1584 = vadd.xlane.f32.xlu0 %v1583_v18  ;;  %v1784_v18 = vld [vmem:[#allocation5 + $0x20] sm:$0xff] }
0x136a   :  { %1594 = vrot.lane.b32.xlu1 %v2731_v31, %s2504_s15 }
0x136e   :  { %1654 = vrot.lane.b32.xlu1 %v2015_v32, %s2513_s2 }
0x1373   :  { %1599 = vrot.lane.b32.xlu0 %v2731_v31, %s2513_s2 }
0x13e2   :  { %v1582_v22 = vpop.xlane.xlu1 %1581 }
0x13e3   :  { %v1586_v33 = vmul.f32 0.03125, %v1582_v22 }
0x13e5   :  { %v1588_v34 = vadd.f32 1e-05, %v1586_v33 }
0x13e6   :  { %v1585_v35 = vpop.xlane.xlu0 %1584  ;;  %v1595_v42 = vpop.permute.xlu1 %1594 }
0x13e7   :  { %2429 = vrsqrt.f32 %v1588_v34  ;;  %v1587_v36 = vmul.f32 0.03125, %v1585_v35  ;;  %v1788_v35 = vld [vmem:[#allocation5 + $0xb0] sm:$0x3] }
0x13e9   :  { %v1589_v37 = vadd.f32 1e-05, %v1587_v36  ;;  %v1862_v36 = vld [vmem:[#allocation5 + $0x30] sm:$0xff] }
0x13ea   :  { %v1600_v40 = vpop.permute.xlu0 %1599  ;;  %v1655_v50 = vpop.permute.xlu1 %1654 }
0x13eb   :  { %2431 = vrsqrt.f32 %v1589_v37 }
0x13f4   :  { %v2430_v27 = vpop.eup %2429 }
0x13f5   :  { %v1592_v41 = vmul.f32 %v2430_v27, %v1576_v19  ;;  %v1866_v19 = vld [vmem:[#allocation5 + $0x50] sm:$0xff] }
0x13f7   :  { %v1597_v45 = vmul.f32 %v1595_v42, %v1592_v41  ;;  %v2021_v41 = vld [vmem:[#allocation5 + $0xc8] ss:$0 sm:$0xff] }
0x13f8   :  { %v2432_v43 = vpop.eup %2431 }
0x13f9   :  { %v1593_v44 = vmul.f32 %v2432_v43, %v1577_v30  ;;  %v1602_v31 = vadd.f32 %v1600_v40, %v1597_v45 }
0x13fb   :  { %v1598_v46 = vmul.f32 %v1595_v42, %v1593_v44 }
0x13fd   :  { %v1603_v47 = vadd.f32 %v1600_v40, %v1598_v46 }
0x13ff   :  { %v1604_v48 = vpack.c.bf16 %v1603_v47, %v1602_v31 }
0x1401   :  { %2258 = vmatmul.mubr.msk.bf16.vlgmr.msra.gmra.mxu1 %vm148_vm6, %v1604_v48 }
0x1402   :  { %2273 = vmatprep.mubr.msk.bf16.mxu1 %vm2511_vm2, %v2510_v1  ;;  %2270 = vmatpush3.bf16.msra.mxu1 %v2351_v63 }
0x1403   :  { %2271 = vmatprep.subr.bf16.mxu1 %v2510_v1 }
0x1406   :  { %2272 = vmatpush3.bf16.msra.mxu1 %v2352_v0 }
0x1407   :  { %2284 = vmatprep.subr.mxu1 %v2510_v1 }
0x14c1   :  { %v1642_v51 = vpop.f32.mrf.mxu1 }
0x14c2   :  { %v1657_v38 = vadd.f32 %v1655_v50, %v1642_v51 }
0x14c3   :  { %v2259_v52 = vpop.f32.mrf.mxu1 }
0x14c4   :  { %v1659_v59 = vmax.f32 %v1657_v38, 0.0 }
0x14c5   :  { %v1645_v55 = vpop.f32.mrf.mxu1 }
0x14c6   :  { %v1658_v56 = vadd.f32 %v1655_v50, %v1645_v55 }
0x14c7   :  { %v2260_v57 = vpop.f32.mrf.mxu1 }
0x14c8   :  { %v1660_v7 = vmax.f32 %v1658_v56, 0.0 }
0x14ca   :  { %v1661_v39 = vpack.c.bf16 %v1660_v7, %v1659_v59 }
0x14cc   :  { %1663 = vrot.lane.b32.xlu1 %v1661_v39, %s2512_s0 }
0x153e   :  { %v1664_v62 = vpop.permute.xlu1 %1663 }
0x153f   :  { %2266 = vmatmul.mubr.msk.bf16.vlgmr.msra.gmra.mxu0 %vm148_vm6, %v1664_v62 }
0x1540   :  { %2281 = vmatprep.mubr.msk.f32.mxu0 %vm2511_vm2, %v2510_v1 }
0x15ff   :  { %v1702_v2 = vpop.f32.mrf.mxu0 }
0x1600   :  { %v1709_v3 = vadd.f32 %v2015_v32, %v1702_v2 }
0x1601   :  { %v2267_v4 = vpop.f32.mrf.mxu0 }
0x1602   :  { %1713 = vrot.lane.b32.xlu0 %v1709_v3, %s2512_s0 }
0x1603   :  { %v1705_v5 = vpop.f32.mrf.mxu0 }
0x1604   :  { %v1710_v6 = vadd.f32 %v2015_v32, %v1705_v5 }
0x1605   :  { %v2268_v8 = vpop.f32.mrf.mxu0 }
0x1606   :  { %1715 = vrot.lane.b32.xlu1 %v1710_v6, %s2512_s0 }
0x1674   :  { %v1714_v9 = vpop.permute.xlu0 %1713 }
0x1675   :  { %v1719_v10 = vadd.f32 %v1714_v9, %v2837_v61  ;;  %v1874_v61 = vld [vmem:[#allocation5 + $0x90] sm:$0xff] }
0x1677   :  { %2433 = vtanh.f32 %v1719_v10 }
0x1678   :  { %v1716_v11 = vpop.permute.xlu1 %1715 }
0x1679   :  { %v1720_v60 = vadd.f32 %v1716_v11, %v2842_v49  ;;  %v1870_v49 = vld [vmem:[#allocation5 + $0x70] sm:$0xff] }
0x167b   :  { %2435 = vtanh.f32 %v1720_v60 }
0x1684   :  { %v2434_v13 = vpop.eup %2433 }
0x1688   :  { %v2436_v15 = vpop.eup %2435 }
0x1689   :  { %v1723_v16 = vpack.c.bf16 %v2436_v15, %v2434_v13 }
0x168b   :  { %2274 = vmatmul.mubr.msk.bf16.vlgmr.msra.gmra.mxu1 %vm148_vm6, %v1723_v16 }
0x168c   :  { %2316 = vmatprep.mubr.msk.f32.mxu1 %vm2511_vm2, %v2510_v1  ;;  %2285 = vmatpush3.msra.mxu1 %v1877_v17 }
0x168d   :  { %2286 = vmatprep.subr.mxu1 %v2510_v1 }
0x168e   :  { %2287 = vmatpush3.msra.mxu1 %v1876_v14 }
0x168f   :  { %2288 = vmatprep.subr.mxu1 %v2510_v1 }
0x1690   :  { %2289 = vmatpush3.msra.mxu1 %v1875_v20 }
0x1691   :  { %2290 = vmatprep.subr.mxu1 %v2510_v1 }
0x1692   :  { %2291 = vmatpush3.msra.mxu1 %v1874_v61 }
0x1693   :  { %2292 = vmatprep.subr.mxu1 %v2510_v1 }
0x1694   :  { %2293 = vmatpush3.msra.mxu1 %v1873_v21 }
0x1695   :  { %2294 = vmatprep.subr.mxu1 %v2510_v1 }
0x1696   :  { %2295 = vmatpush3.msra.mxu1 %v1872_v23 }
0x1697   :  { %2296 = vmatprep.subr.mxu1 %v2510_v1 }
0x1698   :  { %2297 = vmatpush3.msra.mxu1 %v1871_v25 }
0x1699   :  { %2298 = vmatprep.subr.mxu1 %v2510_v1 }
0x169a   :  { %2299 = vmatpush3.msra.mxu1 %v1870_v49 }
0x169b   :  { %2300 = vmatprep.subr.mxu1 %v2510_v1 }
0x169c   :  { %2301 = vmatpush3.msra.mxu1 %v1869_v24 }
0x169d   :  { %2302 = vmatprep.subr.mxu1 %v2510_v1 }
0x169e   :  { %2303 = vmatpush3.msra.mxu1 %v1868_v53 }
0x169f   :  { %2304 = vmatprep.subr.mxu1 %v2510_v1 }
0x16a0   :  { %2305 = vmatpush3.msra.mxu1 %v1867_v26 }
0x16a1   :  { %2306 = vmatprep.subr.mxu1 %v2510_v1 }
0x16a2   :  { %2307 = vmatpush3.msra.mxu1 %v1866_v19 }
0x16a3   :  { %2308 = vmatprep.subr.mxu1 %v2510_v1 }
0x16a4   :  { %2309 = vmatpush3.msra.mxu1 %v1865_v12 }
0x16a5   :  { %2310 = vmatprep.subr.mxu1 %v2510_v1 }
0x16a6   :  { %2311 = vmatpush3.msra.mxu1 %v1864_v28 }
0x16a7   :  { %2312 = vmatprep.subr.mxu1 %v2510_v1 }
0x16a8   :  { %2313 = vmatpush3.msra.mxu1 %v1863_v29 }
0x16a9   :  { %2314 = vmatprep.subr.mxu1 %v2510_v1 }
0x16aa   :  { %2315 = vmatpush3.msra.mxu1 %v1862_v36 }
0x174b   :  { %v1777_v30 = vpop.f32.mrf.mxu1 }
0x174c   :  { %v1786_v34 = vmul.f32 %v1784_v18, %v1777_v30 }
0x174d   :  { %v2275_v58 = vpop.f32.mrf.mxu1 }
0x174f   :  { %v1780_v32 = vpop.f32.mrf.mxu1 }
0x1750   :  { %v1787_v22 = vmul.f32 %v1785_v54, %v1780_v32 }
0x1751   :  { %v2276_v33 = vpop.f32.mrf.mxu1 }
0x1752   :  { %2278 = vmatpush3.msra.mxu0 %v1787_v22 }
0x1753   :  { %2279 = vmatprep.subr.mxu0 %v2510_v1 }
0x1754   :  { %2280 = vmatpush3.msra.mxu0 %v1786_v34 }
0x1755   :  { %2282 = vmatmul.mubr.msk.f32.vlgmr.msra.gmra.mxu0 %vm69_vm5, %v1788_v35 }
0x1815   :  { %v1858_v37 = vpop.f32.mrf.mxu0 }
0x1816   :  { %2317 = vmatmul.mubr.f32.vlgmr.msra.gmra.mxu1 %v1858_v37 }
0x1817   :  { %v2283_v27 = vpop.f32.mrf.mxu0 }
0x18d6   :  { %v1949_v42 = vpop.f32.mrf.mxu1 }
0x18d7   :  { %v1950_v43 = vadd.f32 %v2021_v41, %v1949_v42 }
0x18d8   :  { %v2318_v44 = vpop.f32.mrf.mxu1 }
0x18d9   :  { %1954 = vst.msk [vmem:[#allocation7] sm:$0x3] %vm1953_vm7, %v1950_v43 }
0x18da   :  { %2488 = shalt.err (!%p2485_p0)
}
0x18db   :  { %1964 = dma.vmem_to_hbm [thread:$0]  %s1962_s30, 32, %s2894_s3, [#allocation4]  }
0x18dc   :  { %2501 = dma.done.wait [#allocation4], 32  }
0x18dd   :  { %2502 = vsyncadd [#allocation4], 4294967264 }
0x18de   :  { %1968 = vsyncpa [#allocation3], 1 }
0x18df   :  { %1969 = vsyncpa [#allocation6], 1 }
0x18e0   :  { %1970 = vsyncpa [#allocation4], 1 }

</bundles_post_ra>
